<compile_context>
chip_gen: v6e
topology: v6e:2x2x1
jax: 0.10.0
libtpu: 0.0.40
codegen_flags: <defaults>
</compile_context>

<pallas_src>
import math
from functools import partial

import jax
import jax.numpy as jnp
from jax.experimental import pallas as pl
from jax.experimental.pallas import tpu as pltpu


_SOFTMAX_APPROX_RECIP = True


# ------------------------- helpers -------------------------

def _gelu(x):
    return x * 0.5 * (1.0 + jax.lax.erf(x * (1.0 / math.sqrt(2.0))))


def _pick_tile(dim, target, quanta=(8,)):
    """Largest divisor of `dim` <= target that is a multiple of one of `quanta`
    (tried in order). Falls back to `dim` (full extent is always legal)."""
    if dim <= target:
        return dim
    for q in quanta:
        for t in range(min(target, dim), 0, -1):
            if dim % t == 0 and t % q == 0:
                return t
    return dim


def _pick_tile_m(dim, target):
    # quantum 16 first so bf16 rows stay pair-packed along sublanes, fall back to 8.
    return _pick_tile(dim, target, quanta=(16, 8))


def _pick_tile_lane(dim, target):
    return _pick_tile(dim, target, quanta=(128,))


def _default_vmem_limit():
    try:
        cap = pltpu.get_tpu_info().vmem_capacity_bytes
        return int(min(cap * 3 // 4, 96 * 1024 * 1024))
    except Exception:
        return 32 * 1024 * 1024


_VMEM_LIMIT = _default_vmem_limit()


def _cparams(dims):
    return pltpu.CompilerParams(dimension_semantics=dims,
                                vmem_limit_bytes=_VMEM_LIMIT)


# ------------------------- tiled matmul (+bias, +optional gelu) -------------------------

def _matmul_bias_kernel(x_ref, w_ref, b_ref, o_ref, acc_ref, *, activation, n_k):
    kk = pl.program_id(2)

    @pl.when(kk == 0)
    def _():
        acc_ref[...] = jnp.zeros_like(acc_ref)

    acc_ref[...] += jnp.dot(x_ref[...], w_ref[...],
                            preferred_element_type=jnp.float32)

    @pl.when(kk == n_k - 1)
    def _():
        y = acc_ref[...] + b_ref[...]
        if activation == "gelu":
            y = _gelu(y)
        o_ref[...] = y.astype(o_ref.dtype)


def _matmul_bias_single_kernel(x_ref, w_ref, b_ref, o_ref, *, activation):
    y = jnp.dot(x_ref[...], w_ref[...],
                preferred_element_type=jnp.float32) + b_ref[...]
    if activation == "gelu":
        y = _gelu(y)
    o_ref[...] = y.astype(o_ref.dtype)


def linear(x, w, b, activation=None, out_dtype=None,
           tm=512, tn=512, tk=1024):
    """y = x @ w + b (optionally gelu). x: [M, K], w: [K, N], b: [N]."""
    M, K = x.shape
    N = w.shape[1]
    TM = _pick_tile_m(M, tm)
    TN = _pick_tile_lane(N, tn)
    TK = _pick_tile_lane(K, tk)
    n_m, n_n, n_k = M // TM, N // TN, K // TK
    out_dtype = out_dtype or x.dtype
    b2d = b.reshape(1, N)

    if n_k == 1:
        # single pass: no accumulator scratch, no init/epilogue branches
        return pl.pallas_call(
            partial(_matmul_bias_single_kernel, activation=activation),
            out_shape=jax.ShapeDtypeStruct((M, N), out_dtype),
            grid=(n_m, n_n),
            in_specs=[
                pl.BlockSpec((TM, K), lambda i, j: (i, 0)),
                pl.BlockSpec((K, TN), lambda i, j: (0, j)),
                pl.BlockSpec((1, TN), lambda i, j: (0, j)),
            ],
            out_specs=pl.BlockSpec((TM, TN), lambda i, j: (i, j)),
            compiler_params=_cparams(("parallel", "parallel")),
        )(x, w, b2d)

    return pl.pallas_call(
        partial(_matmul_bias_kernel, activation=activation, n_k=n_k),
        out_shape=jax.ShapeDtypeStruct((M, N), out_dtype),
        grid=(n_m, n_n, n_k),
        in_specs=[
            pl.BlockSpec((TM, TK), lambda i, j, k: (i, k)),
            pl.BlockSpec((TK, TN), lambda i, j, k: (k, j)),
            pl.BlockSpec((1, TN), lambda i, j, k: (0, j)),
        ],
        out_specs=pl.BlockSpec((TM, TN), lambda i, j, k: (i, j)),
        scratch_shapes=[pltpu.VMEM((TM, TN), jnp.float32)],
        compiler_params=_cparams(("parallel", "parallel", "arbitrary")),
    )(x, w, b2d)


# ------------------- fused matmul + bias + residual + LayerNorm -------------------

def _ln_epilogue(h, g_ref, be_ref, o_ref, eps):
    mu = jnp.mean(h, axis=-1, keepdims=True)
    var = jnp.mean((h - mu) * (h - mu), axis=-1, keepdims=True)
    nrm = (h - mu) * jax.lax.rsqrt(var + eps)
    o_ref[...] = (nrm * g_ref[...] + be_ref[...]).astype(o_ref.dtype)


def _matmul_res_ln_kernel(x_ref, w_ref, b_ref, r_ref, g_ref, be_ref,
                          o_ref, acc_ref, *, eps, n_k):
    kk = pl.program_id(1)

    @pl.when(kk == 0)
    def _():
        acc_ref[...] = jnp.zeros_like(acc_ref)

    acc_ref[...] += jnp.dot(x_ref[...], w_ref[...],
                            preferred_element_type=jnp.float32)

    @pl.when(kk == n_k - 1)
    def _():
        h = acc_ref[...] + b_ref[...] + r_ref[...]          # f32
        _ln_epilogue(h, g_ref, be_ref, o_ref, eps)


def _matmul_res_ln_single_kernel(x_ref, w_ref, b_ref, r_ref, g_ref, be_ref,
                                 o_ref, *, eps):
    h = jnp.dot(x_ref[...], w_ref[...],
                preferred_element_type=jnp.float32) + b_ref[...] + r_ref[...]
    _ln_epilogue(h, g_ref, be_ref, o_ref, eps)


def linear_residual_layernorm(x, w, b, residual, gamma, beta,
                              eps=1e-12, out_dtype=None, tm=512, tk=1024):
    """LayerNorm(x @ w + b + residual). x: [M, K], w: [K, N] (N not tiled: LN needs full rows)."""
    M, K = x.shape
    N = w.shape[1]
    TM = _pick_tile_m(M, tm)
    TK = _pick_tile_lane(K, tk)
    n_m, n_k = M // TM, K // TK
    out_dtype = out_dtype or x.dtype
    b2d, g2d, be2d = b.reshape(1, N), gamma.reshape(1, N), beta.reshape(1, N)

    if n_k == 1:
        return pl.pallas_call(
            partial(_matmul_res_ln_single_kernel, eps=eps),
            out_shape=jax.ShapeDtypeStruct((M, N), out_dtype),
            grid=(n_m,),
            in_specs=[
                pl.BlockSpec((TM, K), lambda i: (i, 0)),
                pl.BlockSpec((K, N), lambda i: (0, 0)),
                pl.BlockSpec((1, N), lambda i: (0, 0)),
                pl.BlockSpec((TM, N), lambda i: (i, 0)),
                pl.BlockSpec((1, N), lambda i: (0, 0)),
                pl.BlockSpec((1, N), lambda i: (0, 0)),
            ],
            out_specs=pl.BlockSpec((TM, N), lambda i: (i, 0)),
            compiler_params=_cparams(("parallel",)),
        )(x, w, b2d, residual, g2d, be2d)

    return pl.pallas_call(
        partial(_matmul_res_ln_kernel, eps=eps, n_k=n_k),
        out_shape=jax.ShapeDtypeStruct((M, N), out_dtype),
        grid=(n_m, n_k),
        in_specs=[
            pl.BlockSpec((TM, TK), lambda i, k: (i, k)),
            pl.BlockSpec((TK, N), lambda i, k: (k, 0)),
            pl.BlockSpec((1, N), lambda i, k: (0, 0)),
            pl.BlockSpec((TM, N), lambda i, k: (i, 0)),
            pl.BlockSpec((1, N), lambda i, k: (0, 0)),
            pl.BlockSpec((1, N), lambda i, k: (0, 0)),
        ],
        out_specs=pl.BlockSpec((TM, N), lambda i, k: (i, 0)),
        scratch_shapes=[pltpu.VMEM((TM, N), jnp.float32)],
        compiler_params=_cparams(("parallel", "arbitrary")),
    )(x, w, b2d, residual, g2d, be2d)


# --------------- fused FFN: gelu(x@W1+b1)@W2+b2 + residual + LayerNorm ---------------

def _ffn_kernel(x_ref, w1_ref, b1_ref, w2_ref, b2_ref, r_ref, g_ref, be_ref,
                o_ref, acc_ref, *, eps, n_k):
    kk = pl.program_id(1)

    @pl.when(kk == 0)
    def _():
        acc_ref[...] = jnp.zeros_like(acc_ref)

    h1 = jnp.dot(x_ref[...], w1_ref[...],
                 preferred_element_type=jnp.float32) + b1_ref[...]
    h1 = _gelu(h1)
    acc_ref[...] += jnp.dot(h1.astype(w2_ref.dtype), w2_ref[...],
                            preferred_element_type=jnp.float32)

    @pl.when(kk == n_k - 1)
    def _():
        h = acc_ref[...] + b2_ref[...] + r_ref[...]          # f32
        _ln_epilogue(h, g_ref, be_ref, o_ref, eps)


def ffn_residual_layernorm(x, w1, b1, w2, b2, residual, gamma, beta,
                           eps=1e-12, out_dtype=None, tm=512, ti=512):
    """LayerNorm(gelu(x@w1+b1)@w2 + b2 + residual). Intermediate dim tiled as the reduction axis."""
    M, H = x.shape
    I = w1.shape[1]
    TM = _pick_tile_m(M, tm)
    TI = _pick_tile_lane(I, ti)
    n_m, n_i = M // TM, I // TI
    out_dtype = out_dtype or x.dtype
    return pl.pallas_call(
        partial(_ffn_kernel, eps=eps, n_k=n_i),
        out_shape=jax.ShapeDtypeStruct((M, H), out_dtype),
        grid=(n_m, n_i),
        in_specs=[
            pl.BlockSpec((TM, H), lambda i, k: (i, 0)),      # x (resident across k)
            pl.BlockSpec((H, TI), lambda i, k: (0, k)),      # W1 column block
            pl.BlockSpec((1, TI), lambda i, k: (0, k)),      # b1 block
            pl.BlockSpec((TI, H), lambda i, k: (k, 0)),      # W2 row block
            pl.BlockSpec((1, H), lambda i, k: (0, 0)),       # b2
            pl.BlockSpec((TM, H), lambda i, k: (i, 0)),      # residual
            pl.BlockSpec((1, H), lambda i, k: (0, 0)),       # gamma
            pl.BlockSpec((1, H), lambda i, k: (0, 0)),       # beta
        ],
        out_specs=pl.BlockSpec((TM, H), lambda i, k: (i, 0)),
        scratch_shapes=[pltpu.VMEM((TM, H), jnp.float32)],
        compiler_params=_cparams(("parallel", "arbitrary")),
    )(x, w1, b1.reshape(1, I), w2, b2.reshape(1, H), residual,
      gamma.reshape(1, H), beta.reshape(1, H))


# ------------------------- attention (q-tiled, all heads per step) -------------------------

def _attention_kernel(*refs, num_heads, scale, has_mask):
    if has_mask:
        q_ref, kv_ref, mask_ref, o_ref = refs
        mask_row = mask_ref[...].astype(jnp.float32)           # [1 or Tq, Sk]
    else:
        q_ref, kv_ref, o_ref = refs
        mask_row = None

    q = q_ref[...]                                             # [Tq, H]
    q = q * jnp.array(scale, dtype=q.dtype)                    # scale folded once into q
    kv = kv_ref[...]                                           # [Sk, 2H]
    H = q.shape[-1]
    k, v = kv[:, :H], kv[:, H:]
    Dh = H // num_heads

    for h in range(num_heads):                 # static head loop; per-head store bounds live set
        sl = slice(h * Dh, (h + 1) * Dh)
        # contract last dims (trans-B) -> no explicit k transpose / XLU work
        s = jax.lax.dot_general(q[:, sl], k[:, sl], (((1,), (1,)), ((), ())),
                                preferred_element_type=jnp.float32)
        if mask_row is not None:
            s = s + mask_row                   # broadcast in-kernel (never materialized)
        s = s - jnp.max(s, axis=-1, keepdims=True)             # stable softmax
        p = jnp.exp(s)
        denom = jnp.sum(p, axis=-1, keepdims=True)
        if _SOFTMAX_APPROX_RECIP:
            p = p * pl.reciprocal(denom, approx=True)
        else:
            p = p / denom
        ctx = jnp.dot(p.astype(v.dtype), v[:, sl],
                      preferred_element_type=jnp.float32)
        o_ref[:, sl] = ctx.astype(o_ref.dtype)                 # direct per-head store


def fused_attention(q, kv, mask, num_heads, tq=256):
    """q: [B, Sq, H]; kv: [B, Sk, 2H] (fused K|V); mask: [B, 1, mq, Sk] additive or None.
    Grid = (B, Sq//Tq); K/V block stays resident across the q-tile axis. -> [B, Sq, H]."""
    B, Sq, H = q.shape
    Sk = kv.shape[1]
    scale = 1.0 / math.sqrt(H // num_heads)
    TQ = _pick_tile_m(Sq, tq)
    n_q = Sq // TQ
    has_mask = mask is not None

    in_specs = [
        pl.BlockSpec((pl.Squeezed(), TQ, H), lambda b, qi: (b, qi, 0)),
        pl.BlockSpec((pl.Squeezed(), Sk, 2 * H), lambda b, qi: (b, 0, 0)),
    ]
    args = [q, kv]
    if has_mask:
        mq = mask.shape[2]
        if mq == 1:
            in_specs.append(pl.BlockSpec((pl.Squeezed(), pl.Squeezed(), 1, Sk),
                                         lambda b, qi: (b, 0, 0, 0)))
        else:
            in_specs.append(pl.BlockSpec((pl.Squeezed(), pl.Squeezed(), TQ, Sk),
                                         lambda b, qi: (b, 0, qi, 0)))
        args.append(mask)

    return pl.pallas_call(
        partial(_attention_kernel, num_heads=num_heads, scale=scale,
                has_mask=has_mask),
        out_shape=jax.ShapeDtypeStruct((B, Sq, H), q.dtype),
        grid=(B, n_q),
        in_specs=in_specs,
        out_specs=pl.BlockSpec((pl.Squeezed(), TQ, H), lambda b, qi: (b, qi, 0)),
        compiler_params=_cparams(("parallel", "parallel")),
    )(*args)


# ------------------------- model glue (plain JAX, reshapes only) -------------------------

def bert_layer(x, attention_mask, cross_feats, p, num_heads):
    B, S, H = x.shape
    M = B * S
    x2d = x.reshape(M, H)

    # --- self-attention block: q proj + fused K|V proj, fused out-proj + residual + LN ---
    q = linear(x2d, p["self_q"][0], p["self_q"][1])                          # [M, H]
    kv = linear(x2d, p["self_kv"][0], p["self_kv"][1])                       # [M, 2H]
    self_ctx = fused_attention(q.reshape(B, S, H), kv.reshape(B, S, 2 * H),
                               attention_mask, num_heads)
    attn_out = linear_residual_layernorm(self_ctx.reshape(M, H),
                                         p["self_o"][0], p["self_o"][1],
                                         x2d, p["self_ln"][0], p["self_ln"][1])

    # --- cross-attention block ('va_concate': KV = concat(video, audio), no mask) ---
    if cross_feats is not None:
        Bk, Sk, Hc = cross_feats.shape
        q2 = linear(attn_out, p["cross_q"][0], p["cross_q"][1])              # [M, H]
        kv2 = linear(cross_feats.reshape(Bk * Sk, Hc),
                     p["cross_kv"][0], p["cross_kv"][1])                     # [Bk*Sk, 2H]
        cross_ctx = fused_attention(q2.reshape(B, S, H),
                                    kv2.reshape(Bk, Sk, 2 * H), None, num_heads)
        attn_out = linear_residual_layernorm(cross_ctx.reshape(M, H),
                                             p["cross_o"][0], p["cross_o"][1],
                                             attn_out, p["cross_ln"][0], p["cross_ln"][1])

    # --- feed-forward block (fully fused; [M, I] intermediate never hits HBM) ---
    out = ffn_residual_layernorm(attn_out,
                                 p["inter"][0], p["inter"][1],
                                 p["out"][0], p["out"][1],
                                 attn_out, p["out_ln"][0], p["out_ln"][1])
    return out.reshape(B, S, H)


_WEIGHT_KEYS = ("self_q", "self_kv", "self_o", "cross_q", "cross_kv", "cross_o",
                "inter", "out")


def prepare_layer_params(layer_params, compute_dtype):
    """Cast weight matrices to the compute dtype ONCE (outside the forward / jit).
    Biases and LayerNorm params stay f32 (added to the f32 accumulator)."""
    prepared = []
    for p in layer_params:
        np_ = dict(p)
        for k in _WEIGHT_KEYS:
            w, b = p[k]
            np_[k] = (w.astype(compute_dtype), b.astype(jnp.float32))
        for k in ("self_ln", "cross_ln", "out_ln"):
            g, b = p[k]
            np_[k] = (g.astype(jnp.float32), b.astype(jnp.float32))
        prepared.append(np_)
    return prepared


def bert_encoder(hidden_states, attention_mask, video_feat, audio_feat,
                 layer_params, num_heads, compute_dtype=jnp.bfloat16):
    """layer_params must already be prepared with prepare_layer_params(compute_dtype)."""
    cd = compute_dtype
    hidden_states = hidden_states.astype(cd)
    if attention_mask is not None:
        attention_mask = attention_mask.astype(jnp.float32)
    feats = [f.astype(cd) for f in (video_feat, audio_feat) if f is not None]
    cross_feats = jnp.concatenate(feats, axis=1) if feats else None   # layer-invariant, hoisted
    for p in layer_params:
        hidden_states = bert_layer(hidden_states, attention_mask, cross_feats, p, num_heads)
    return hidden_states


# ------------------------- pure-JAX reference (for parity check) -------------------------

def _ref_layernorm(x, g, b, eps=1e-12):
    mu = jnp.mean(x, axis=-1, keepdims=True)
    var = jnp.mean((x - mu) ** 2, axis=-1, keepdims=True)
    return (x - mu) / jnp.sqrt(var + eps) * g + b


def _ref_attention(q, k, v, mask, num_heads):
    B, Sq, H = q.shape
    Sk = k.shape[1]
    Dh = H // num_heads
    qh = q.reshape(B, Sq, num_heads, Dh).transpose(0, 2, 1, 3)
    kh = k.reshape(B, Sk, num_heads, Dh).transpose(0, 2, 1, 3)
    vh = v.reshape(B, Sk, num_heads, Dh).transpose(0, 2, 1, 3)
    s = jnp.einsum("bhqd,bhkd->bhqk", qh, kh) / math.sqrt(Dh)
    if mask is not None:
        s = s + mask
    p = jax.nn.softmax(s, axis=-1)
    ctx = jnp.einsum("bhqk,bhkd->bhqd", p, vh)
    return ctx.transpose(0, 2, 1, 3).reshape(B, Sq, H)


def bert_encoder_ref(hidden_states, attention_mask, video_feat, audio_feat,
                     layer_params, num_heads):
    x = hidden_states
    feats = [f for f in (video_feat, audio_feat) if f is not None]
    cross = jnp.concatenate(feats, axis=1) if feats else None
    for p in layer_params:
        H = x.shape[-1]
        q = x @ p["self_q"][0] + p["self_q"][1]
        kv = x @ p["self_kv"][0] + p["self_kv"][1]
        ctx = _ref_attention(q, kv[..., :H], kv[..., H:], attention_mask, num_heads)
        attn = _ref_layernorm(ctx @ p["self_o"][0] + p["self_o"][1] + x, *p["self_ln"])
        if cross is not None:
            q2 = attn @ p["cross_q"][0] + p["cross_q"][1]
            kv2 = cross @ p["cross_kv"][0] + p["cross_kv"][1]
            ctx2 = _ref_attention(q2, kv2[..., :H], kv2[..., H:], None, num_heads)
            attn = _ref_layernorm(ctx2 @ p["cross_o"][0] + p["cross_o"][1] + attn,
                                  *p["cross_ln"])
        h1 = _gelu(attn @ p["inter"][0] + p["inter"][1])
        x = _ref_layernorm(h1 @ p["out"][0] + p["out"][1] + attn, *p["out_ln"])
    return x


# ------------------------- deterministic parameter init -------------------------

def init_linear_params(key, fan_in, fan_out):
    kw, kb = jax.random.split(key)
    w = jax.random.normal(kw, (fan_in, fan_out), jnp.float32) * 0.02
    b = jax.random.normal(kb, (fan_out,), jnp.float32) * 0.02
    return (w, b)


def init_layer_params(key, hidden, intermediate):
    keys = jax.random.split(key, 10)
    q = init_linear_params(keys[0], hidden, hidden)
    k = init_linear_params(keys[1], hidden, hidden)
    v = init_linear_params(keys[2], hidden, hidden)
    cq = init_linear_params(keys[4], hidden, hidden)
    ck = init_linear_params(keys[5], hidden, hidden)
    cv = init_linear_params(keys[6], hidden, hidden)
    ones = jnp.ones((hidden,), jnp.float32)
    zeros = jnp.zeros((hidden,), jnp.float32)
    return {
        "self_q": q,
        # fused K|V projection for the self-attention stream
        "self_kv": (jnp.concatenate([k[0], v[0]], axis=1),
                    jnp.concatenate([k[1], v[1]], axis=0)),
        "self_o": init_linear_params(keys[3], hidden, hidden),
        "self_ln": (ones, zeros),
        "cross_q": cq,
        # fused K|V projection for the cross (video+audio) stream
        "cross_kv": (jnp.concatenate([ck[0], cv[0]], axis=1),
                     jnp.concatenate([ck[1], cv[1]], axis=0)),
        "cross_o": init_linear_params(keys[7], hidden, hidden),
        "cross_ln": (ones, zeros),
        "inter": init_linear_params(keys[8], hidden, intermediate),
        "out": init_linear_params(keys[9], intermediate, hidden),
        "out_ln": (ones, zeros),
    }


if __name__ == "__main__":
    # Small config consistent with the module:
    B, S = 2, 8                 # batch, text seq len
    H, NH = 32, 4               # hidden_size, num_attention_heads
    I = 64                      # intermediate_size
    NUM_LAYERS = 2              # num_hidden_layers
    SV, SA = 4, 4               # video / audio feature seq lens

    key = jax.random.PRNGKey(0)
    k_h, k_v, k_a, k_p = jax.random.split(key, 4)

    hidden_states = jax.random.normal(k_h, (B, S, H), jnp.float32)
    video_feat = jax.random.normal(k_v, (B, SV, H), jnp.float32)
    audio_feat = jax.random.normal(k_a, (B, SA, H), jnp.float32)

    # Standard BERT extended attention mask: [B, 1, 1, S] with 0 for valid, -10000 for masked.
    valid_lens = jnp.array([S, S - 2], dtype=jnp.int32)
    pos = jnp.arange(S)[None, :]
    valid = (pos < valid_lens[:, None]).astype(jnp.float32)        # [B, S]
    attention_mask = ((1.0 - valid) * -10000.0)[:, None, None, :]  # [B, 1, 1, S]

    layer_keys = jax.random.split(k_p, NUM_LAYERS)
    layer_params = [init_layer_params(layer_keys[i], H, I) for i in range(NUM_LAYERS)]

    # --- bf16 fast path (recommended for v6e/v7x): weights cast once, outside the forward ---
    params_bf16 = prepare_layer_params(layer_params, jnp.bfloat16)
    encoder_bf16 = jax.jit(partial(bert_encoder, num_heads=NH, compute_dtype=jnp.bfloat16))
    out_bf16 = jax.block_until_ready(
        encoder_bf16(hidden_states, attention_mask, video_feat, audio_feat, params_bf16))
    assert out_bf16.shape == (B, S, H) and out_bf16.dtype == jnp.bfloat16
    assert bool(jnp.isfinite(out_bf16.astype(jnp.float32)).all())

    # --- f32 parity path: check against a pure-JAX reference of the PyTorch module ---
    params_f32 = prepare_layer_params(layer_params, jnp.float32)
    encoder_f32 = jax.jit(partial(bert_encoder, num_heads=NH, compute_dtype=jnp.float32))
    out_f32 = jax.block_until_ready(
        encoder_f32(hidden_states, attention_mask, video_feat, audio_feat, params_f32))
    ref = bert_encoder_ref(hidden_states, attention_mask, video_feat, audio_feat,
                           params_f32, NH)
    assert out_f32.shape == (B, S, H) and out_f32.dtype == jnp.float32
    assert bool(jnp.allclose(out_f32, ref, atol=2e-2, rtol=2e-2))

    print("KERNEL_OK")
</pallas_src>

<mosaic_0001>
module attributes {stable_mosaic.version = 11 : i64} {
  func.func @_matmul_bias_single_kernel(%arg0: i32, %arg1: i32, %arg2: memref<16x32xbf16, #tpu.memory_space<vmem>>, %arg3: memref<32x64xbf16, #tpu.memory_space<vmem>>, %arg4: memref<1x64xf32, #tpu.memory_space<vmem>>, %arg5: memref<16x64xbf16, #tpu.memory_space<vmem>>) attributes {dimension_semantics = [#tpu.dimension_semantics<parallel>, #tpu.dimension_semantics<parallel>], iteration_bounds = array<i64: 1, 1>, scalar_prefetch = 0 : i64, scratch_operands = 0 : i64, tpu.core_type = #tpu.core_type<tc>, window_params = [{transform_indices = @transform_0, window_bounds = array<i64: 16, 32>}, {transform_indices = @transform_1, window_bounds = array<i64: 32, 64>}, {transform_indices = @transform_2, window_bounds = array<i64: 1, 64>}, {transform_indices = @transform_3, window_bounds = array<i64: 16, 64>}]} {
    %c0 = arith.constant 0 : index
    %c0_0 = arith.constant 0 : index
    %0 = vector.load %arg2[%c0, %c0_0] : memref<16x32xbf16, #tpu.memory_space<vmem>>, vector<16x32xbf16>
    %c0_1 = arith.constant 0 : index
    %c0_2 = arith.constant 0 : index
    %1 = vector.load %arg3[%c0_1, %c0_2] : memref<32x64xbf16, #tpu.memory_space<vmem>>, vector<32x64xbf16>
    %cst = arith.constant dense<0.000000e+00> : vector<16x64xf32>
    %2 = tpu.matmul %0, %1, %cst {dimension_numbers = #tpu.dot_dimension_numbers<[1], [0], [0], [1], [0, 0, 1, 1], [], []>} : vector<16x32xbf16>, vector<32x64xbf16>, vector<16x64xf32> -> vector<16x64xf32>
    %c0_3 = arith.constant 0 : index
    %c0_4 = arith.constant 0 : index
    %3 = vector.load %arg4[%c0_3, %c0_4] : memref<1x64xf32, #tpu.memory_space<vmem>>, vector<1x64xf32>
    %4 = vector.broadcast %3 : vector<1x64xf32> to vector<16x64xf32>
    %5 = arith.addf %2, %4 : vector<16x64xf32>
    %6 = arith.truncf %5 : vector<16x64xf32> to vector<16x64xbf16>
    %c0_5 = arith.constant 0 : index
    %c0_6 = arith.constant 0 : index
    %7 = vector.load %arg5[%c0_5, %c0_6] : memref<16x64xbf16, #tpu.memory_space<vmem>>, vector<16x64xbf16>
    tpu.vector_store %arg5[%c0_5, %c0_6], %6 {strides = array<i32>} : memref<16x64xbf16, #tpu.memory_space<vmem>>, vector<16x64xbf16>,
    return
  }
  func.func @transform_0(%arg0: i32, %arg1: i32) -> (i32, i32) {
    %c0_i32 = arith.constant 0 : i32
    %c0_i32_0 = arith.constant 0 : i32
    return %arg0, %c0_i32 : i32, i32
  }
  func.func @transform_1(%arg0: i32, %arg1: i32) -> (i32, i32) {
    %c0_i32 = arith.constant 0 : i32
    %c0_i32_0 = arith.constant 0 : i32
    return %c0_i32, %arg1 : i32, i32
  }
  func.func @transform_2(%arg0: i32, %arg1: i32) -> (i32, i32) {
    %c0_i32 = arith.constant 0 : i32
    %c0_i32_0 = arith.constant 0 : i32
    return %c0_i32, %arg1 : i32, i32
  }
  func.func @transform_3(%arg0: i32, %arg1: i32) -> (i32, i32) {
    %c0_i32 = arith.constant 0 : i32
    return %arg0, %arg1 : i32, i32
  }
}

module attributes {stable_mosaic.version = 11 : i64} {
  func.func @_matmul_res_ln_single_kernel(%arg0: i32, %arg1: memref<16x32xbf16, #tpu.memory_space<vmem>>, %arg2: memref<32x32xbf16, #tpu.memory_space<vmem>>, %arg3: memref<1x32xf32, #tpu.memory_space<vmem>>, %arg4: memref<16x32xbf16, #tpu.memory_space<vmem>>, %arg5: memref<1x32xf32, #tpu.memory_space<vmem>>, %arg6: memref<1x32xf32, #tpu.memory_space<vmem>>, %arg7: memref<16x32xbf16, #tpu.memory_space<vmem>>) attributes {dimension_semantics = [#tpu.dimension_semantics<parallel>], iteration_bounds = array<i64: 1>, scalar_prefetch = 0 : i64, scratch_operands = 0 : i64, tpu.core_type = #tpu.core_type<tc>, window_params = [{transform_indices = @transform_0, window_bounds = array<i64: 16, 32>}, {pipeline_mode = #tpu.pipeline_mode<synchronous>, transform_indices = @transform_1, window_bounds = array<i64: 32, 32>}, {pipeline_mode = #tpu.pipeline_mode<synchronous>, transform_indices = @transform_2, window_bounds = array<i64: 1, 32>}, {transform_indices = @transform_3, window_bounds = array<i64: 16, 32>}, {pipeline_mode = #tpu.pipeline_mode<synchronous>, transform_indices = @transform_4, window_bounds = array<i64: 1, 32>}, {pipeline_mode = #tpu.pipeline_mode<synchronous>, transform_indices = @transform_5, window_bounds = array<i64: 1, 32>}, {transform_indices = @transform_6, window_bounds = array<i64: 16, 32>}]} {
    %c0 = arith.constant 0 : index
    %c0_0 = arith.constant 0 : index
    %0 = vector.load %arg1[%c0, %c0_0] : memref<16x32xbf16, #tpu.memory_space<vmem>>, vector<16x32xbf16>
    %c0_1 = arith.constant 0 : index
    %c0_2 = arith.constant 0 : index
    %1 = vector.load %arg2[%c0_1, %c0_2] : memref<32x32xbf16, #tpu.memory_space<vmem>>, vector<32x32xbf16>
    %cst = arith.constant dense<0.000000e+00> : vector<16x32xf32>
    %2 = tpu.matmul %0, %1, %cst {dimension_numbers = #tpu.dot_dimension_numbers<[1], [0], [0], [1], [0, 0, 1, 1], [], []>} : vector<16x32xbf16>, vector<32x32xbf16>, vector<16x32xf32> -> vector<16x32xf32>
    %c0_3 = arith.constant 0 : index
    %c0_4 = arith.constant 0 : index
    %3 = vector.load %arg3[%c0_3, %c0_4] : memref<1x32xf32, #tpu.memory_space<vmem>>, vector<1x32xf32>
    %4 = vector.broadcast %3 : vector<1x32xf32> to vector<16x32xf32>
    %5 = arith.addf %2, %4 : vector<16x32xf32>
    %c0_5 = arith.constant 0 : index
    %c0_6 = arith.constant 0 : index
    %6 = vector.load %arg4[%c0_5, %c0_6] : memref<16x32xbf16, #tpu.memory_space<vmem>>, vector<16x32xbf16>
    %7 = arith.extf %6 : vector<16x32xbf16> to vector<16x32xf32>
    %8 = arith.addf %5, %7 : vector<16x32xf32>
    %cst_7 = arith.constant dense<0.000000e+00> : vector<16xf32>
    %9 = vector.multi_reduction <add>, %8, %cst_7 [1] : vector<16x32xf32> to vector<16xf32>
    %10 = vector.shape_cast %9 : vector<16xf32> to vector<16x1xf32>
    %cst_8 = arith.constant 3.200000e+01 : f32
    %11 = vector.broadcast %cst_8 : f32 to vector<16x1xf32>
    %12 = arith.divf %10, %11 : vector<16x1xf32>
    %13 = vector.broadcast %12 : vector<16x1xf32> to vector<16x32xf32>
    %14 = arith.subf %8, %13 : vector<16x32xf32>
    %15 = vector.broadcast %12 : vector<16x1xf32> to vector<16x32xf32>
    %16 = arith.subf %8, %15 : vector<16x32xf32>
    %17 = arith.mulf %14, %16 : vector<16x32xf32>
    %cst_9 = arith.constant dense<0.000000e+00> : vector<16xf32>
    %18 = vector.multi_reduction <add>, %17, %cst_9 [1] : vector<16x32xf32> to vector<16xf32>
    %19 = vector.shape_cast %18 : vector<16xf32> to vector<16x1xf32>
    %cst_10 = arith.constant 3.200000e+01 : f32
    %20 = vector.broadcast %cst_10 : f32 to vector<16x1xf32>
    %21 = arith.divf %19, %20 : vector<16x1xf32>
    %22 = vector.broadcast %12 : vector<16x1xf32> to vector<16x32xf32>
    %23 = arith.subf %8, %22 : vector<16x32xf32>
    %cst_11 = arith.constant 9.99999996E-13 : f32
    %24 = vector.broadcast %cst_11 : f32 to vector<16x1xf32>
    %25 = arith.addf %21, %24 : vector<16x1xf32>
    %26 = math.rsqrt %25 : vector<16x1xf32>
    %27 = vector.broadcast %26 : vector<16x1xf32> to vector<16x32xf32>
    %28 = arith.mulf %23, %27 : vector<16x32xf32>
    %c0_12 = arith.constant 0 : index
    %c0_13 = arith.constant 0 : index
    %29 = vector.load %arg5[%c0_12, %c0_13] : memref<1x32xf32, #tpu.memory_space<vmem>>, vector<1x32xf32>
    %30 = vector.broadcast %29 : vector<1x32xf32> to vector<16x32xf32>
    %31 = arith.mulf %28, %30 : vector<16x32xf32>
    %c0_14 = arith.constant 0 : index
    %c0_15 = arith.constant 0 : index
    %32 = vector.load %arg6[%c0_14, %c0_15] : memref<1x32xf32, #tpu.memory_space<vmem>>, vector<1x32xf32>
    %33 = vector.broadcast %32 : vector<1x32xf32> to vector<16x32xf32>
    %34 = arith.addf %31, %33 : vector<16x32xf32>
    %35 = arith.truncf %34 : vector<16x32xf32> to vector<16x32xbf16>
    %c0_16 = arith.constant 0 : index
    %c0_17 = arith.constant 0 : index
    %36 = vector.load %arg7[%c0_16, %c0_17] : memref<16x32xbf16, #tpu.memory_space<vmem>>, vector<16x32xbf16>
    tpu.vector_store %arg7[%c0_16, %c0_17], %35 {strides = array<i32>} : memref<16x32xbf16, #tpu.memory_space<vmem>>, vector<16x32xbf16>,
    return
  }
  func.func @transform_0(%arg0: i32) -> (i32, i32) {
    %c0_i32 = arith.constant 0 : i32
    %c0_i32_0 = arith.constant 0 : i32
    return %arg0, %c0_i32 : i32, i32
  }
  func.func @transform_1(%arg0: i32) -> (i32, i32) {
    %c0_i32 = arith.constant 0 : i32
    %c0_i32_0 = arith.constant 0 : i32
    %c0_i32_1 = arith.constant 0 : i32
    return %c0_i32, %c0_i32_0 : i32, i32
  }
  func.func @transform_2(%arg0: i32) -> (i32, i32) {
    %c0_i32 = arith.constant 0 : i32
    %c0_i32_0 = arith.constant 0 : i32
    %c0_i32_1 = arith.constant 0 : i32
    return %c0_i32, %c0_i32_0 : i32, i32
  }
  func.func @transform_3(%arg0: i32) -> (i32, i32) {
    %c0_i32 = arith.constant 0 : i32
    %c0_i32_0 = arith.constant 0 : i32
    return %arg0, %c0_i32 : i32, i32
  }
  func.func @transform_4(%arg0: i32) -> (i32, i32) {
    %c0_i32 = arith.constant 0 : i32
    %c0_i32_0 = arith.constant 0 : i32
    %c0_i32_1 = arith.constant 0 : i32
    return %c0_i32, %c0_i32_0 : i32, i32
  }
  func.func @transform_5(%arg0: i32) -> (i32, i32) {
    %c0_i32 = arith.constant 0 : i32
    %c0_i32_0 = arith.constant 0 : i32
    %c0_i32_1 = arith.constant 0 : i32
    return %c0_i32, %c0_i32_0 : i32, i32
  }
  func.func @transform_6(%arg0: i32) -> (i32, i32) {
    %c0_i32 = arith.constant 0 : i32
    %c0_i32_0 = arith.constant 0 : i32
    return %arg0, %c0_i32 : i32, i32
  }
}

module attributes {stable_mosaic.version = 11 : i64} {
  func.func @_matmul_bias_single_kernel(%arg0: i32, %arg1: i32, %arg2: memref<16x32xbf16, #tpu.memory_space<vmem>>, %arg3: memref<32x32xbf16, #tpu.memory_space<vmem>>, %arg4: memref<1x32xf32, #tpu.memory_space<vmem>>, %arg5: memref<16x32xbf16, #tpu.memory_space<vmem>>) attributes {dimension_semantics = [#tpu.dimension_semantics<parallel>, #tpu.dimension_semantics<parallel>], iteration_bounds = array<i64: 1, 1>, scalar_prefetch = 0 : i64, scratch_operands = 0 : i64, tpu.core_type = #tpu.core_type<tc>, window_params = [{transform_indices = @transform_0, window_bounds = array<i64: 16, 32>}, {transform_indices = @transform_1, window_bounds = array<i64: 32, 32>}, {transform_indices = @transform_2, window_bounds = array<i64: 1, 32>}, {transform_indices = @transform_3, window_bounds = array<i64: 16, 32>}]} {
    %c0 = arith.constant 0 : index
    %c0_0 = arith.constant 0 : index
    %0 = vector.load %arg2[%c0, %c0_0] : memref<16x32xbf16, #tpu.memory_space<vmem>>, vector<16x32xbf16>
    %c0_1 = arith.constant 0 : index
    %c0_2 = arith.constant 0 : index
    %1 = vector.load %arg3[%c0_1, %c0_2] : memref<32x32xbf16, #tpu.memory_space<vmem>>, vector<32x32xbf16>
    %cst = arith.constant dense<0.000000e+00> : vector<16x32xf32>
    %2 = tpu.matmul %0, %1, %cst {dimension_numbers = #tpu.dot_dimension_numbers<[1], [0], [0], [1], [0, 0, 1, 1], [], []>} : vector<16x32xbf16>, vector<32x32xbf16>, vector<16x32xf32> -> vector<16x32xf32>
    %c0_3 = arith.constant 0 : index
    %c0_4 = arith.constant 0 : index
    %3 = vector.load %arg4[%c0_3, %c0_4] : memref<1x32xf32, #tpu.memory_space<vmem>>, vector<1x32xf32>
    %4 = vector.broadcast %3 : vector<1x32xf32> to vector<16x32xf32>
    %5 = arith.addf %2, %4 : vector<16x32xf32>
    %6 = arith.truncf %5 : vector<16x32xf32> to vector<16x32xbf16>
    %c0_5 = arith.constant 0 : index
    %c0_6 = arith.constant 0 : index
    %7 = vector.load %arg5[%c0_5, %c0_6] : memref<16x32xbf16, #tpu.memory_space<vmem>>, vector<16x32xbf16>
    tpu.vector_store %arg5[%c0_5, %c0_6], %6 {strides = array<i32>} : memref<16x32xbf16, #tpu.memory_space<vmem>>, vector<16x32xbf16>,
    return
  }
  func.func @transform_0(%arg0: i32, %arg1: i32) -> (i32, i32) {
    %c0_i32 = arith.constant 0 : i32
    %c0_i32_0 = arith.constant 0 : i32
    return %arg0, %c0_i32 : i32, i32
  }
  func.func @transform_1(%arg0: i32, %arg1: i32) -> (i32, i32) {
    %c0_i32 = arith.constant 0 : i32
    %c0_i32_0 = arith.constant 0 : i32
    return %c0_i32, %arg1 : i32, i32
  }
  func.func @transform_2(%arg0: i32, %arg1: i32) -> (i32, i32) {
    %c0_i32 = arith.constant 0 : i32
    %c0_i32_0 = arith.constant 0 : i32
    return %c0_i32, %arg1 : i32, i32
  }
  func.func @transform_3(%arg0: i32, %arg1: i32) -> (i32, i32) {
    %c0_i32 = arith.constant 0 : i32
    return %arg0, %arg1 : i32, i32
  }
}

module attributes {stable_mosaic.version = 11 : i64} {
  func.func @_attention_kernel(%arg0: i32, %arg1: i32, %arg2: memref<1x8x32xbf16, #tpu.memory_space<vmem>>, %arg3: memref<1x8x64xbf16, #tpu.memory_space<vmem>>, %arg4: memref<1x1x1x8xf32, #tpu.memory_space<vmem>>, %arg5: memref<1x8x32xbf16, #tpu.memory_space<vmem>>) attributes {dimension_semantics = [#tpu.dimension_semantics<parallel>, #tpu.dimension_semantics<parallel>], iteration_bounds = array<i64: 2, 1>, scalar_prefetch = 0 : i64, scratch_operands = 0 : i64, tpu.core_type = #tpu.core_type<tc>, window_params = [{transform_indices = @transform_0, window_bounds = array<i64: 1, 8, 32>}, {transform_indices = @transform_1, window_bounds = array<i64: 1, 8, 64>}, {transform_indices = @transform_2, window_bounds = array<i64: 1, 1, 1, 8>}, {transform_indices = @transform_3, window_bounds = array<i64: 1, 8, 32>}]} {
    %c0 = arith.constant 0 : index
    %c0_0 = arith.constant 0 : index
    %c0_1 = arith.constant 0 : index
    %c0_2 = arith.constant 0 : index
    %0 = vector.load %arg4[%c0, %c0_0, %c0_1, %c0_2] : memref<1x1x1x8xf32, #tpu.memory_space<vmem>>, vector<1x1x1x8xf32>
    %1 = vector.shape_cast %0 : vector<1x1x1x8xf32> to vector<1x8xf32>
    %c0_3 = arith.constant 0 : index
    %c0_4 = arith.constant 0 : index
    %c0_5 = arith.constant 0 : index
    %2 = vector.load %arg2[%c0_3, %c0_4, %c0_5] : memref<1x8x32xbf16, #tpu.memory_space<vmem>>, vector<1x8x32xbf16>
    %3 = vector.shape_cast %2 : vector<1x8x32xbf16> to vector<8x32xbf16>
    %cst = arith.constant 3.535160e-01 : bf16
    %4 = vector.broadcast %cst : bf16 to vector<8x32xbf16>
    %5 = arith.mulf %3, %4 : vector<8x32xbf16>
    %c0_6 = arith.constant 0 : index
    %c0_7 = arith.constant 0 : index
    %c0_8 = arith.constant 0 : index
    %6 = vector.load %arg3[%c0_6, %c0_7, %c0_8] : memref<1x8x64xbf16, #tpu.memory_space<vmem>>, vector<1x8x64xbf16>
    %7 = vector.shape_cast %6 : vector<1x8x64xbf16> to vector<8x64xbf16>
    %8 = vector.extract_strided_slice %7 {offsets = [0, 0], sizes = [8, 32], strides = [1, 1]} : vector<8x64xbf16> to vector<8x32xbf16>
    %9 = vector.extract_strided_slice %7 {offsets = [0, 32], sizes = [8, 32], strides = [1, 1]} : vector<8x64xbf16> to vector<8x32xbf16>
    %10 = vector.extract_strided_slice %5 {offsets = [0, 0], sizes = [8, 8], strides = [1, 1]} : vector<8x32xbf16> to vector<8x8xbf16>
    %11 = vector.extract_strided_slice %8 {offsets = [0, 0], sizes = [8, 8], strides = [1, 1]} : vector<8x32xbf16> to vector<8x8xbf16>
    %cst_9 = arith.constant dense<0.000000e+00> : vector<8x8xf32>
    %12 = tpu.matmul %10, %11, %cst_9 {dimension_numbers = #tpu.dot_dimension_numbers<[1], [1], [0], [0], [0, 0, 1, 0], [], []>} : vector<8x8xbf16>, vector<8x8xbf16>, vector<8x8xf32> -> vector<8x8xf32>
    %13 = vector.broadcast %1 : vector<1x8xf32> to vector<8x8xf32>
    %14 = arith.addf %12, %13 : vector<8x8xf32>
    %cst_10 = arith.constant dense<0xFF800000> : vector<8xf32>
    %15 = vector.multi_reduction <maximumf>, %14, %cst_10 [1] : vector<8x8xf32> to vector<8xf32>
    %16 = vector.shape_cast %15 : vector<8xf32> to vector<8x1xf32>
    %17 = vector.broadcast %16 : vector<8x1xf32> to vector<8x8xf32>
    %18 = arith.subf %14, %17 : vector<8x8xf32>
    %19 = math.exp %18 : vector<8x8xf32>
    %cst_11 = arith.constant dense<0.000000e+00> : vector<8xf32>
    %20 = vector.multi_reduction <add>, %19, %cst_11 [1] : vector<8x8xf32> to vector<8xf32>
    %21 = vector.shape_cast %20 : vector<8xf32> to vector<8x1xf32>
    %22 = tpu.reciprocal %21 {approx = true} : vector<8x1xf32> -> vector<8x1xf32>
    %23 = vector.broadcast %22 : vector<8x1xf32> to vector<8x8xf32>
    %24 = arith.mulf %19, %23 : vector<8x8xf32>
    %25 = arith.truncf %24 : vector<8x8xf32> to vector<8x8xbf16>
    %26 = vector.extract_strided_slice %9 {offsets = [0, 0], sizes = [8, 8], strides = [1, 1]} : vector<8x32xbf16> to vector<8x8xbf16>
    %cst_12 = arith.constant dense<0.000000e+00> : vector<8x8xf32>
    %27 = tpu.matmul %25, %26, %cst_12 {dimension_numbers = #tpu.dot_dimension_numbers<[1], [0], [0], [1], [0, 0, 1, 1], [], []>} : vector<8x8xbf16>, vector<8x8xbf16>, vector<8x8xf32> -> vector<8x8xf32>
    %28 = arith.truncf %27 : vector<8x8xf32> to vector<8x8xbf16>
    %c0_13 = arith.constant 0 : index
    %c0_14 = arith.constant 0 : index
    %c0_15 = arith.constant 0 : index
    %29 = vector.load %arg5[%c0_13, %c0_14, %c0_15] : memref<1x8x32xbf16, #tpu.memory_space<vmem>>, vector<1x8x8xbf16>
    %30 = vector.shape_cast %29 : vector<1x8x8xbf16> to vector<8x8xbf16>
    %31 = vector.shape_cast %28 : vector<8x8xbf16> to vector<1x8x8xbf16>
    tpu.vector_store %arg5[%c0_13, %c0_14, %c0_15], %31 {strides = array<i32>} : memref<1x8x32xbf16, #tpu.memory_space<vmem>>, vector<1x8x8xbf16>,
    %32 = vector.extract_strided_slice %5 {offsets = [0, 8], sizes = [8, 8], strides = [1, 1]} : vector<8x32xbf16> to vector<8x8xbf16>
    %33 = vector.extract_strided_slice %8 {offsets = [0, 8], sizes = [8, 8], strides = [1, 1]} : vector<8x32xbf16> to vector<8x8xbf16>
    %cst_16 = arith.constant dense<0.000000e+00> : vector<8x8xf32>
    %34 = tpu.matmul %32, %33, %cst_16 {dimension_numbers = #tpu.dot_dimension_numbers<[1], [1], [0], [0], [0, 0, 1, 0], [], []>} : vector<8x8xbf16>, vector<8x8xbf16>, vector<8x8xf32> -> vector<8x8xf32>
    %35 = vector.broadcast %1 : vector<1x8xf32> to vector<8x8xf32>
    %36 = arith.addf %34, %35 : vector<8x8xf32>
    %cst_17 = arith.constant dense<0xFF800000> : vector<8xf32>
    %37 = vector.multi_reduction <maximumf>, %36, %cst_17 [1] : vector<8x8xf32> to vector<8xf32>
    %38 = vector.shape_cast %37 : vector<8xf32> to vector<8x1xf32>
    %39 = vector.broadcast %38 : vector<8x1xf32> to vector<8x8xf32>
    %40 = arith.subf %36, %39 : vector<8x8xf32>
    %41 = math.exp %40 : vector<8x8xf32>
    %cst_18 = arith.constant dense<0.000000e+00> : vector<8xf32>
    %42 = vector.multi_reduction <add>, %41, %cst_18 [1] : vector<8x8xf32> to vector<8xf32>
    %43 = vector.shape_cast %42 : vector<8xf32> to vector<8x1xf32>
    %44 = tpu.reciprocal %43 {approx = true} : vector<8x1xf32> -> vector<8x1xf32>
    %45 = vector.broadcast %44 : vector<8x1xf32> to vector<8x8xf32>
    %46 = arith.mulf %41, %45 : vector<8x8xf32>
    %47 = arith.truncf %46 : vector<8x8xf32> to vector<8x8xbf16>
    %48 = vector.extract_strided_slice %9 {offsets = [0, 8], sizes = [8, 8], strides = [1, 1]} : vector<8x32xbf16> to vector<8x8xbf16>
    %cst_19 = arith.constant dense<0.000000e+00> : vector<8x8xf32>
    %49 = tpu.matmul %47, %48, %cst_19 {dimension_numbers = #tpu.dot_dimension_numbers<[1], [0], [0], [1], [0, 0, 1, 1], [], []>} : vector<8x8xbf16>, vector<8x8xbf16>, vector<8x8xf32> -> vector<8x8xf32>
    %50 = arith.truncf %49 : vector<8x8xf32> to vector<8x8xbf16>
    %c0_20 = arith.constant 0 : index
    %c0_21 = arith.constant 0 : index
    %c8 = arith.constant 8 : index
    %51 = vector.load %arg5[%c0_20, %c0_21, %c8] : memref<1x8x32xbf16, #tpu.memory_space<vmem>>, vector<1x8x8xbf16>
    %52 = vector.shape_cast %51 : vector<1x8x8xbf16> to vector<8x8xbf16>
    %53 = vector.shape_cast %50 : vector<8x8xbf16> to vector<1x8x8xbf16>
    tpu.vector_store %arg5[%c0_20, %c0_21, %c8], %53 {strides = array<i32>} : memref<1x8x32xbf16, #tpu.memory_space<vmem>>, vector<1x8x8xbf16>,
    %54 = vector.extract_strided_slice %5 {offsets = [0, 16], sizes = [8, 8], strides = [1, 1]} : vector<8x32xbf16> to vector<8x8xbf16>
    %55 = vector.extract_strided_slice %8 {offsets = [0, 16], sizes = [8, 8], strides = [1, 1]} : vector<8x32xbf16> to vector<8x8xbf16>
    %cst_22 = arith.constant dense<0.000000e+00> : vector<8x8xf32>
    %56 = tpu.matmul %54, %55, %cst_22 {dimension_numbers = #tpu.dot_dimension_numbers<[1], [1], [0], [0], [0, 0, 1, 0], [], []>} : vector<8x8xbf16>, vector<8x8xbf16>, vector<8x8xf32> -> vector<8x8xf32>
    %57 = vector.broadcast %1 : vector<1x8xf32> to vector<8x8xf32>
    %58 = arith.addf %56, %57 : vector<8x8xf32>
    %cst_23 = arith.constant dense<0xFF800000> : vector<8xf32>
    %59 = vector.multi_reduction <maximumf>, %58, %cst_23 [1] : vector<8x8xf32> to vector<8xf32>
    %60 = vector.shape_cast %59 : vector<8xf32> to vector<8x1xf32>
    %61 = vector.broadcast %60 : vector<8x1xf32> to vector<8x8xf32>
    %62 = arith.subf %58, %61 : vector<8x8xf32>
    %63 = math.exp %62 : vector<8x8xf32>
    %cst_24 = arith.constant dense<0.000000e+00> : vector<8xf32>
    %64 = vector.multi_reduction <add>, %63, %cst_24 [1] : vector<8x8xf32> to vector<8xf32>
    %65 = vector.shape_cast %64 : vector<8xf32> to vector<8x1xf32>
    %66 = tpu.reciprocal %65 {approx = true} : vector<8x1xf32> -> vector<8x1xf32>
    %67 = vector.broadcast %66 : vector<8x1xf32> to vector<8x8xf32>
    %68 = arith.mulf %63, %67 : vector<8x8xf32>
    %69 = arith.truncf %68 : vector<8x8xf32> to vector<8x8xbf16>
    %70 = vector.extract_strided_slice %9 {offsets = [0, 16], sizes = [8, 8], strides = [1, 1]} : vector<8x32xbf16> to vector<8x8xbf16>
    %cst_25 = arith.constant dense<0.000000e+00> : vector<8x8xf32>
    %71 = tpu.matmul %69, %70, %cst_25 {dimension_numbers = #tpu.dot_dimension_numbers<[1], [0], [0], [1], [0, 0, 1, 1], [], []>} : vector<8x8xbf16>, vector<8x8xbf16>, vector<8x8xf32> -> vector<8x8xf32>
    %72 = arith.truncf %71 : vector<8x8xf32> to vector<8x8xbf16>
    %c0_26 = arith.constant 0 : index
    %c0_27 = arith.constant 0 : index
    %c16 = arith.constant 16 : index
    %73 = vector.load %arg5[%c0_26, %c0_27, %c16] : memref<1x8x32xbf16, #tpu.memory_space<vmem>>, vector<1x8x8xbf16>
    %74 = vector.shape_cast %73 : vector<1x8x8xbf16> to vector<8x8xbf16>
    %75 = vector.shape_cast %72 : vector<8x8xbf16> to vector<1x8x8xbf16>
    tpu.vector_store %arg5[%c0_26, %c0_27, %c16], %75 {strides = array<i32>} : memref<1x8x32xbf16, #tpu.memory_space<vmem>>, vector<1x8x8xbf16>,
    %76 = vector.extract_strided_slice %5 {offsets = [0, 24], sizes = [8, 8], strides = [1, 1]} : vector<8x32xbf16> to vector<8x8xbf16>
    %77 = vector.extract_strided_slice %8 {offsets = [0, 24], sizes = [8, 8], strides = [1, 1]} : vector<8x32xbf16> to vector<8x8xbf16>
    %cst_28 = arith.constant dense<0.000000e+00> : vector<8x8xf32>
    %78 = tpu.matmul %76, %77, %cst_28 {dimension_numbers = #tpu.dot_dimension_numbers<[1], [1], [0], [0], [0, 0, 1, 0], [], []>} : vector<8x8xbf16>, vector<8x8xbf16>, vector<8x8xf32> -> vector<8x8xf32>
    %79 = vector.broadcast %1 : vector<1x8xf32> to vector<8x8xf32>
    %80 = arith.addf %78, %79 : vector<8x8xf32>
    %cst_29 = arith.constant dense<0xFF800000> : vector<8xf32>
    %81 = vector.multi_reduction <maximumf>, %80, %cst_29 [1] : vector<8x8xf32> to vector<8xf32>
    %82 = vector.shape_cast %81 : vector<8xf32> to vector<8x1xf32>
    %83 = vector.broadcast %82 : vector<8x1xf32> to vector<8x8xf32>
    %84 = arith.subf %80, %83 : vector<8x8xf32>
    %85 = math.exp %84 : vector<8x8xf32>
    %cst_30 = arith.constant dense<0.000000e+00> : vector<8xf32>
    %86 = vector.multi_reduction <add>, %85, %cst_30 [1] : vector<8x8xf32> to vector<8xf32>
    %87 = vector.shape_cast %86 : vector<8xf32> to vector<8x1xf32>
    %88 = tpu.reciprocal %87 {approx = true} : vector<8x1xf32> -> vector<8x1xf32>
    %89 = vector.broadcast %88 : vector<8x1xf32> to vector<8x8xf32>
    %90 = arith.mulf %85, %89 : vector<8x8xf32>
    %91 = arith.truncf %90 : vector<8x8xf32> to vector<8x8xbf16>
    %92 = vector.extract_strided_slice %9 {offsets = [0, 24], sizes = [8, 8], strides = [1, 1]} : vector<8x32xbf16> to vector<8x8xbf16>
    %cst_31 = arith.constant dense<0.000000e+00> : vector<8x8xf32>
    %93 = tpu.matmul %91, %92, %cst_31 {dimension_numbers = #tpu.dot_dimension_numbers<[1], [0], [0], [1], [0, 0, 1, 1], [], []>} : vector<8x8xbf16>, vector<8x8xbf16>, vector<8x8xf32> -> vector<8x8xf32>
    %94 = arith.truncf %93 : vector<8x8xf32> to vector<8x8xbf16>
    %c0_32 = arith.constant 0 : index
    %c0_33 = arith.constant 0 : index
    %c24 = arith.constant 24 : index
    %95 = vector.load %arg5[%c0_32, %c0_33, %c24] : memref<1x8x32xbf16, #tpu.memory_space<vmem>>, vector<1x8x8xbf16>
    %96 = vector.shape_cast %95 : vector<1x8x8xbf16> to vector<8x8xbf16>
    %97 = vector.shape_cast %94 : vector<8x8xbf16> to vector<1x8x8xbf16>
    tpu.vector_store %arg5[%c0_32, %c0_33, %c24], %97 {strides = array<i32>} : memref<1x8x32xbf16, #tpu.memory_space<vmem>>, vector<1x8x8xbf16>,
    return
  }
  func.func @transform_0(%arg0: i32, %arg1: i32) -> (i32, i32, i32) {
    %c0_i32 = arith.constant 0 : i32
    %c0_i32_0 = arith.constant 0 : i32
    return %arg0, %arg1, %c0_i32 : i32, i32, i32
  }
  func.func @transform_1(%arg0: i32, %arg1: i32) -> (i32, i32, i32) {
    %c0_i32 = arith.constant 0 : i32
    %c0_i32_0 = arith.constant 0 : i32
    %c0_i32_1 = arith.constant 0 : i32
    return %arg0, %c0_i32, %c0_i32_0 : i32, i32, i32
  }
  func.func @transform_2(%arg0: i32, %arg1: i32) -> (i32, i32, i32, i32) {
    %c0_i32 = arith.constant 0 : i32
    %c0_i32_0 = arith.constant 0 : i32
    %c0_i32_1 = arith.constant 0 : i32
    %c0_i32_2 = arith.constant 0 : i32
    return %arg0, %c0_i32, %c0_i32_0, %c0_i32_1 : i32, i32, i32, i32
  }
  func.func @transform_3(%arg0: i32, %arg1: i32) -> (i32, i32, i32) {
    %c0_i32 = arith.constant 0 : i32
    %c0_i32_0 = arith.constant 0 : i32
    return %arg0, %arg1, %c0_i32 : i32, i32, i32
  }
}

module attributes {stable_mosaic.version = 11 : i64} {
  func.func @_attention_kernel(%arg0: i32, %arg1: i32, %arg2: memref<1x8x32xbf16, #tpu.memory_space<vmem>>, %arg3: memref<1x8x64xbf16, #tpu.memory_space<vmem>>, %arg4: memref<1x8x32xbf16, #tpu.memory_space<vmem>>) attributes {dimension_semantics = [#tpu.dimension_semantics<parallel>, #tpu.dimension_semantics<parallel>], iteration_bounds = array<i64: 2, 1>, scalar_prefetch = 0 : i64, scratch_operands = 0 : i64, tpu.core_type = #tpu.core_type<tc>, window_params = [{transform_indices = @transform_0, window_bounds = array<i64: 1, 8, 32>}, {transform_indices = @transform_1, window_bounds = array<i64: 1, 8, 64>}, {transform_indices = @transform_2, window_bounds = array<i64: 1, 8, 32>}]} {
    %c0 = arith.constant 0 : index
    %c0_0 = arith.constant 0 : index
    %c0_1 = arith.constant 0 : index
    %0 = vector.load %arg2[%c0, %c0_0, %c0_1] : memref<1x8x32xbf16, #tpu.memory_space<vmem>>, vector<1x8x32xbf16>
    %1 = vector.shape_cast %0 : vector<1x8x32xbf16> to vector<8x32xbf16>
    %cst = arith.constant 3.535160e-01 : bf16
    %2 = vector.broadcast %cst : bf16 to vector<8x32xbf16>
    %3 = arith.mulf %1, %2 : vector<8x32xbf16>
    %c0_2 = arith.constant 0 : index
    %c0_3 = arith.constant 0 : index
    %c0_4 = arith.constant 0 : index
    %4 = vector.load %arg3[%c0_2, %c0_3, %c0_4] : memref<1x8x64xbf16, #tpu.memory_space<vmem>>, vector<1x8x64xbf16>
    %5 = vector.shape_cast %4 : vector<1x8x64xbf16> to vector<8x64xbf16>
    %6 = vector.extract_strided_slice %5 {offsets = [0, 0], sizes = [8, 32], strides = [1, 1]} : vector<8x64xbf16> to vector<8x32xbf16>
    %7 = vector.extract_strided_slice %5 {offsets = [0, 32], sizes = [8, 32], strides = [1, 1]} : vector<8x64xbf16> to vector<8x32xbf16>
    %8 = vector.extract_strided_slice %3 {offsets = [0, 0], sizes = [8, 8], strides = [1, 1]} : vector<8x32xbf16> to vector<8x8xbf16>
    %9 = vector.extract_strided_slice %6 {offsets = [0, 0], sizes = [8, 8], strides = [1, 1]} : vector<8x32xbf16> to vector<8x8xbf16>
    %cst_5 = arith.constant dense<0.000000e+00> : vector<8x8xf32>
    %10 = tpu.matmul %8, %9, %cst_5 {dimension_numbers = #tpu.dot_dimension_numbers<[1], [1], [0], [0], [0, 0, 1, 0], [], []>} : vector<8x8xbf16>, vector<8x8xbf16>, vector<8x8xf32> -> vector<8x8xf32>
    %cst_6 = arith.constant dense<0xFF800000> : vector<8xf32>
    %11 = vector.multi_reduction <maximumf>, %10, %cst_6 [1] : vector<8x8xf32> to vector<8xf32>
    %12 = vector.shape_cast %11 : vector<8xf32> to vector<8x1xf32>
    %13 = vector.broadcast %12 : vector<8x1xf32> to vector<8x8xf32>
    %14 = arith.subf %10, %13 : vector<8x8xf32>
    %15 = math.exp %14 : vector<8x8xf32>
    %cst_7 = arith.constant dense<0.000000e+00> : vector<8xf32>
    %16 = vector.multi_reduction <add>, %15, %cst_7 [1] : vector<8x8xf32> to vector<8xf32>
    %17 = vector.shape_cast %16 : vector<8xf32> to vector<8x1xf32>
    %18 = tpu.reciprocal %17 {approx = true} : vector<8x1xf32> -> vector<8x1xf32>
    %19 = vector.broadcast %18 : vector<8x1xf32> to vector<8x8xf32>
    %20 = arith.mulf %15, %19 : vector<8x8xf32>
    %21 = arith.truncf %20 : vector<8x8xf32> to vector<8x8xbf16>
    %22 = vector.extract_strided_slice %7 {offsets = [0, 0], sizes = [8, 8], strides = [1, 1]} : vector<8x32xbf16> to vector<8x8xbf16>
    %cst_8 = arith.constant dense<0.000000e+00> : vector<8x8xf32>
    %23 = tpu.matmul %21, %22, %cst_8 {dimension_numbers = #tpu.dot_dimension_numbers<[1], [0], [0], [1], [0, 0, 1, 1], [], []>} : vector<8x8xbf16>, vector<8x8xbf16>, vector<8x8xf32> -> vector<8x8xf32>
    %24 = arith.truncf %23 : vector<8x8xf32> to vector<8x8xbf16>
    %c0_9 = arith.constant 0 : index
    %c0_10 = arith.constant 0 : index
    %c0_11 = arith.constant 0 : index
    %25 = vector.load %arg4[%c0_9, %c0_10, %c0_11] : memref<1x8x32xbf16, #tpu.memory_space<vmem>>, vector<1x8x8xbf16>
    %26 = vector.shape_cast %25 : vector<1x8x8xbf16> to vector<8x8xbf16>
    %27 = vector.shape_cast %24 : vector<8x8xbf16> to vector<1x8x8xbf16>
    tpu.vector_store %arg4[%c0_9, %c0_10, %c0_11], %27 {strides = array<i32>} : memref<1x8x32xbf16, #tpu.memory_space<vmem>>, vector<1x8x8xbf16>,
    %28 = vector.extract_strided_slice %3 {offsets = [0, 8], sizes = [8, 8], strides = [1, 1]} : vector<8x32xbf16> to vector<8x8xbf16>
    %29 = vector.extract_strided_slice %6 {offsets = [0, 8], sizes = [8, 8], strides = [1, 1]} : vector<8x32xbf16> to vector<8x8xbf16>
    %cst_12 = arith.constant dense<0.000000e+00> : vector<8x8xf32>
    %30 = tpu.matmul %28, %29, %cst_12 {dimension_numbers = #tpu.dot_dimension_numbers<[1], [1], [0], [0], [0, 0, 1, 0], [], []>} : vector<8x8xbf16>, vector<8x8xbf16>, vector<8x8xf32> -> vector<8x8xf32>
    %cst_13 = arith.constant dense<0xFF800000> : vector<8xf32>
    %31 = vector.multi_reduction <maximumf>, %30, %cst_13 [1] : vector<8x8xf32> to vector<8xf32>
    %32 = vector.shape_cast %31 : vector<8xf32> to vector<8x1xf32>
    %33 = vector.broadcast %32 : vector<8x1xf32> to vector<8x8xf32>
    %34 = arith.subf %30, %33 : vector<8x8xf32>
    %35 = math.exp %34 : vector<8x8xf32>
    %cst_14 = arith.constant dense<0.000000e+00> : vector<8xf32>
    %36 = vector.multi_reduction <add>, %35, %cst_14 [1] : vector<8x8xf32> to vector<8xf32>
    %37 = vector.shape_cast %36 : vector<8xf32> to vector<8x1xf32>
    %38 = tpu.reciprocal %37 {approx = true} : vector<8x1xf32> -> vector<8x1xf32>
    %39 = vector.broadcast %38 : vector<8x1xf32> to vector<8x8xf32>
    %40 = arith.mulf %35, %39 : vector<8x8xf32>
    %41 = arith.truncf %40 : vector<8x8xf32> to vector<8x8xbf16>
    %42 = vector.extract_strided_slice %7 {offsets = [0, 8], sizes = [8, 8], strides = [1, 1]} : vector<8x32xbf16> to vector<8x8xbf16>
    %cst_15 = arith.constant dense<0.000000e+00> : vector<8x8xf32>
    %43 = tpu.matmul %41, %42, %cst_15 {dimension_numbers = #tpu.dot_dimension_numbers<[1], [0], [0], [1], [0, 0, 1, 1], [], []>} : vector<8x8xbf16>, vector<8x8xbf16>, vector<8x8xf32> -> vector<8x8xf32>
    %44 = arith.truncf %43 : vector<8x8xf32> to vector<8x8xbf16>
    %c0_16 = arith.constant 0 : index
    %c0_17 = arith.constant 0 : index
    %c8 = arith.constant 8 : index
    %45 = vector.load %arg4[%c0_16, %c0_17, %c8] : memref<1x8x32xbf16, #tpu.memory_space<vmem>>, vector<1x8x8xbf16>
    %46 = vector.shape_cast %45 : vector<1x8x8xbf16> to vector<8x8xbf16>
    %47 = vector.shape_cast %44 : vector<8x8xbf16> to vector<1x8x8xbf16>
    tpu.vector_store %arg4[%c0_16, %c0_17, %c8], %47 {strides = array<i32>} : memref<1x8x32xbf16, #tpu.memory_space<vmem>>, vector<1x8x8xbf16>,
    %48 = vector.extract_strided_slice %3 {offsets = [0, 16], sizes = [8, 8], strides = [1, 1]} : vector<8x32xbf16> to vector<8x8xbf16>
    %49 = vector.extract_strided_slice %6 {offsets = [0, 16], sizes = [8, 8], strides = [1, 1]} : vector<8x32xbf16> to vector<8x8xbf16>
    %cst_18 = arith.constant dense<0.000000e+00> : vector<8x8xf32>
    %50 = tpu.matmul %48, %49, %cst_18 {dimension_numbers = #tpu.dot_dimension_numbers<[1], [1], [0], [0], [0, 0, 1, 0], [], []>} : vector<8x8xbf16>, vector<8x8xbf16>, vector<8x8xf32> -> vector<8x8xf32>
    %cst_19 = arith.constant dense<0xFF800000> : vector<8xf32>
    %51 = vector.multi_reduction <maximumf>, %50, %cst_19 [1] : vector<8x8xf32> to vector<8xf32>
    %52 = vector.shape_cast %51 : vector<8xf32> to vector<8x1xf32>
    %53 = vector.broadcast %52 : vector<8x1xf32> to vector<8x8xf32>
    %54 = arith.subf %50, %53 : vector<8x8xf32>
    %55 = math.exp %54 : vector<8x8xf32>
    %cst_20 = arith.constant dense<0.000000e+00> : vector<8xf32>
    %56 = vector.multi_reduction <add>, %55, %cst_20 [1] : vector<8x8xf32> to vector<8xf32>
    %57 = vector.shape_cast %56 : vector<8xf32> to vector<8x1xf32>
    %58 = tpu.reciprocal %57 {approx = true} : vector<8x1xf32> -> vector<8x1xf32>
    %59 = vector.broadcast %58 : vector<8x1xf32> to vector<8x8xf32>
    %60 = arith.mulf %55, %59 : vector<8x8xf32>
    %61 = arith.truncf %60 : vector<8x8xf32> to vector<8x8xbf16>
    %62 = vector.extract_strided_slice %7 {offsets = [0, 16], sizes = [8, 8], strides = [1, 1]} : vector<8x32xbf16> to vector<8x8xbf16>
    %cst_21 = arith.constant dense<0.000000e+00> : vector<8x8xf32>
    %63 = tpu.matmul %61, %62, %cst_21 {dimension_numbers = #tpu.dot_dimension_numbers<[1], [0], [0], [1], [0, 0, 1, 1], [], []>} : vector<8x8xbf16>, vector<8x8xbf16>, vector<8x8xf32> -> vector<8x8xf32>
    %64 = arith.truncf %63 : vector<8x8xf32> to vector<8x8xbf16>
    %c0_22 = arith.constant 0 : index
    %c0_23 = arith.constant 0 : index
    %c16 = arith.constant 16 : index
    %65 = vector.load %arg4[%c0_22, %c0_23, %c16] : memref<1x8x32xbf16, #tpu.memory_space<vmem>>, vector<1x8x8xbf16>
    %66 = vector.shape_cast %65 : vector<1x8x8xbf16> to vector<8x8xbf16>
    %67 = vector.shape_cast %64 : vector<8x8xbf16> to vector<1x8x8xbf16>
    tpu.vector_store %arg4[%c0_22, %c0_23, %c16], %67 {strides = array<i32>} : memref<1x8x32xbf16, #tpu.memory_space<vmem>>, vector<1x8x8xbf16>,
    %68 = vector.extract_strided_slice %3 {offsets = [0, 24], sizes = [8, 8], strides = [1, 1]} : vector<8x32xbf16> to vector<8x8xbf16>
    %69 = vector.extract_strided_slice %6 {offsets = [0, 24], sizes = [8, 8], strides = [1, 1]} : vector<8x32xbf16> to vector<8x8xbf16>
    %cst_24 = arith.constant dense<0.000000e+00> : vector<8x8xf32>
    %70 = tpu.matmul %68, %69, %cst_24 {dimension_numbers = #tpu.dot_dimension_numbers<[1], [1], [0], [0], [0, 0, 1, 0], [], []>} : vector<8x8xbf16>, vector<8x8xbf16>, vector<8x8xf32> -> vector<8x8xf32>
    %cst_25 = arith.constant dense<0xFF800000> : vector<8xf32>
    %71 = vector.multi_reduction <maximumf>, %70, %cst_25 [1] : vector<8x8xf32> to vector<8xf32>
    %72 = vector.shape_cast %71 : vector<8xf32> to vector<8x1xf32>
    %73 = vector.broadcast %72 : vector<8x1xf32> to vector<8x8xf32>
    %74 = arith.subf %70, %73 : vector<8x8xf32>
    %75 = math.exp %74 : vector<8x8xf32>
    %cst_26 = arith.constant dense<0.000000e+00> : vector<8xf32>
    %76 = vector.multi_reduction <add>, %75, %cst_26 [1] : vector<8x8xf32> to vector<8xf32>
    %77 = vector.shape_cast %76 : vector<8xf32> to vector<8x1xf32>
    %78 = tpu.reciprocal %77 {approx = true} : vector<8x1xf32> -> vector<8x1xf32>
    %79 = vector.broadcast %78 : vector<8x1xf32> to vector<8x8xf32>
    %80 = arith.mulf %75, %79 : vector<8x8xf32>
    %81 = arith.truncf %80 : vector<8x8xf32> to vector<8x8xbf16>
    %82 = vector.extract_strided_slice %7 {offsets = [0, 24], sizes = [8, 8], strides = [1, 1]} : vector<8x32xbf16> to vector<8x8xbf16>
    %cst_27 = arith.constant dense<0.000000e+00> : vector<8x8xf32>
    %83 = tpu.matmul %81, %82, %cst_27 {dimension_numbers = #tpu.dot_dimension_numbers<[1], [0], [0], [1], [0, 0, 1, 1], [], []>} : vector<8x8xbf16>, vector<8x8xbf16>, vector<8x8xf32> -> vector<8x8xf32>
    %84 = arith.truncf %83 : vector<8x8xf32> to vector<8x8xbf16>
    %c0_28 = arith.constant 0 : index
    %c0_29 = arith.constant 0 : index
    %c24 = arith.constant 24 : index
    %85 = vector.load %arg4[%c0_28, %c0_29, %c24] : memref<1x8x32xbf16, #tpu.memory_space<vmem>>, vector<1x8x8xbf16>
    %86 = vector.shape_cast %85 : vector<1x8x8xbf16> to vector<8x8xbf16>
    %87 = vector.shape_cast %84 : vector<8x8xbf16> to vector<1x8x8xbf16>
    tpu.vector_store %arg4[%c0_28, %c0_29, %c24], %87 {strides = array<i32>} : memref<1x8x32xbf16, #tpu.memory_space<vmem>>, vector<1x8x8xbf16>,
    return
  }
  func.func @transform_0(%arg0: i32, %arg1: i32) -> (i32, i32, i32) {
    %c0_i32 = arith.constant 0 : i32
    %c0_i32_0 = arith.constant 0 : i32
    return %arg0, %arg1, %c0_i32 : i32, i32, i32
  }
  func.func @transform_1(%arg0: i32, %arg1: i32) -> (i32, i32, i32) {
    %c0_i32 = arith.constant 0 : i32
    %c0_i32_0 = arith.constant 0 : i32
    %c0_i32_1 = arith.constant 0 : i32
    return %arg0, %c0_i32, %c0_i32_0 : i32, i32, i32
  }
  func.func @transform_2(%arg0: i32, %arg1: i32) -> (i32, i32, i32) {
    %c0_i32 = arith.constant 0 : i32
    %c0_i32_0 = arith.constant 0 : i32
    return %arg0, %arg1, %c0_i32 : i32, i32, i32
  }
}

module attributes {stable_mosaic.version = 11 : i64} {
  func.func @_ffn_kernel(%arg0: i32, %arg1: i32, %arg2: memref<16x32xbf16, #tpu.memory_space<vmem>>, %arg3: memref<32x64xbf16, #tpu.memory_space<vmem>>, %arg4: memref<1x64xf32, #tpu.memory_space<vmem>>, %arg5: memref<64x32xbf16, #tpu.memory_space<vmem>>, %arg6: memref<1x32xf32, #tpu.memory_space<vmem>>, %arg7: memref<16x32xbf16, #tpu.memory_space<vmem>>, %arg8: memref<1x32xf32, #tpu.memory_space<vmem>>, %arg9: memref<1x32xf32, #tpu.memory_space<vmem>>, %arg10: memref<16x32xbf16, #tpu.memory_space<vmem>>, %arg11: memref<16x32xf32, #tpu.memory_space<vmem>>) attributes {dimension_semantics = [#tpu.dimension_semantics<parallel>, #tpu.dimension_semantics<arbitrary>], iteration_bounds = array<i64: 1, 1>, scalar_prefetch = 0 : i64, scratch_operands = 1 : i64, tpu.core_type = #tpu.core_type<tc>, window_params = [{transform_indices = @transform_0, window_bounds = array<i64: 16, 32>}, {transform_indices = @transform_1, window_bounds = array<i64: 32, 64>}, {transform_indices = @transform_2, window_bounds = array<i64: 1, 64>}, {transform_indices = @transform_3, window_bounds = array<i64: 64, 32>}, {pipeline_mode = #tpu.pipeline_mode<synchronous>, transform_indices = @transform_4, window_bounds = array<i64: 1, 32>}, {transform_indices = @transform_5, window_bounds = array<i64: 16, 32>}, {pipeline_mode = #tpu.pipeline_mode<synchronous>, transform_indices = @transform_6, window_bounds = array<i64: 1, 32>}, {pipeline_mode = #tpu.pipeline_mode<synchronous>, transform_indices = @transform_7, window_bounds = array<i64: 1, 32>}, {transform_indices = @transform_8, window_bounds = array<i64: 16, 32>}]} {
    %c0_i32 = arith.constant 0 : i32
    %0 = arith.cmpi eq, %arg1, %c0_i32 : i32
    %1 = arith.extui %0 : i1 to i32
    %c0_i32_0 = arith.constant 0 : i32
    %2 = arith.cmpi ne, %1, %c0_i32_0 : i32
    scf.if %2 {
      %cst_18 = arith.constant 0.000000e+00 : f32
      %26 = vector.broadcast %cst_18 : f32 to vector<16x32xf32>
      %c0_19 = arith.constant 0 : index
      %c0_20 = arith.constant 0 : index
      %27 = vector.load %arg11[%c0_19, %c0_20] : memref<16x32xf32, #tpu.memory_space<vmem>>, vector<16x32xf32>
      tpu.vector_store %arg11[%c0_19, %c0_20], %26 {strides = array<i32>} : memref<16x32xf32, #tpu.memory_space<vmem>>, vector<16x32xf32>,
    } else {
    }
    %c0 = arith.constant 0 : index
    %c0_1 = arith.constant 0 : index
    %3 = vector.load %arg2[%c0, %c0_1] : memref<16x32xbf16, #tpu.memory_space<vmem>>, vector<16x32xbf16>
    %c0_2 = arith.constant 0 : index
    %c0_3 = arith.constant 0 : index
    %4 = vector.load %arg3[%c0_2, %c0_3] : memref<32x64xbf16, #tpu.memory_space<vmem>>, vector<32x64xbf16>
    %cst = arith.constant dense<0.000000e+00> : vector<16x64xf32>
    %5 = tpu.matmul %3, %4, %cst {dimension_numbers = #tpu.dot_dimension_numbers<[1], [0], [0], [1], [0, 0, 1, 1], [], []>} : vector<16x32xbf16>, vector<32x64xbf16>, vector<16x64xf32> -> vector<16x64xf32>
    %c0_4 = arith.constant 0 : index
    %c0_5 = arith.constant 0 : index
    %6 = vector.load %arg4[%c0_4, %c0_5] : memref<1x64xf32, #tpu.memory_space<vmem>>, vector<1x64xf32>
    %7 = vector.broadcast %6 : vector<1x64xf32> to vector<16x64xf32>
    %8 = arith.addf %5, %7 : vector<16x64xf32>
    %cst_6 = arith.constant 5.000000e-01 : f32
    %9 = vector.broadcast %cst_6 : f32 to vector<16x64xf32>
    %10 = arith.mulf %8, %9 : vector<16x64xf32>
    %cst_7 = arith.constant 0.707106769 : f32
    %11 = vector.broadcast %cst_7 : f32 to vector<16x64xf32>
    %12 = arith.mulf %8, %11 : vector<16x64xf32>
    %13 = math.erf %12 : vector<16x64xf32>
    %cst_8 = arith.constant 1.000000e+00 : f32
    %14 = vector.broadcast %cst_8 : f32 to vector<16x64xf32>
    %15 = arith.addf %14, %13 : vector<16x64xf32>
    %16 = arith.mulf %10, %15 : vector<16x64xf32>
    %c0_9 = arith.constant 0 : index
    %c0_10 = arith.constant 0 : index
    %17 = vector.load %arg11[%c0_9, %c0_10] : memref<16x32xf32, #tpu.memory_space<vmem>>, vector<16x32xf32>
    %18 = arith.truncf %16 : vector<16x64xf32> to vector<16x64xbf16>
    %c0_11 = arith.constant 0 : index
    %c0_12 = arith.constant 0 : index
    %19 = vector.load %arg5[%c0_11, %c0_12] : memref<64x32xbf16, #tpu.memory_space<vmem>>, vector<64x32xbf16>
    %cst_13 = arith.constant dense<0.000000e+00> : vector<16x32xf32>
    %20 = tpu.matmul %18, %19, %cst_13 {dimension_numbers = #tpu.dot_dimension_numbers<[1], [0], [0], [1], [0, 0, 1, 1], [], []>} : vector<16x64xbf16>, vector<64x32xbf16>, vector<16x32xf32> -> vector<16x32xf32>
    %21 = arith.addf %17, %20 : vector<16x32xf32>
    %c0_14 = arith.constant 0 : index
    %c0_15 = arith.constant 0 : index
    %22 = vector.load %arg11[%c0_14, %c0_15] : memref<16x32xf32, #tpu.memory_space<vmem>>, vector<16x32xf32>
    tpu.vector_store %arg11[%c0_14, %c0_15], %21 {strides = array<i32>} : memref<16x32xf32, #tpu.memory_space<vmem>>, vector<16x32xf32>,
    %c0_i32_16 = arith.constant 0 : i32
    %23 = arith.cmpi eq, %arg1, %c0_i32_16 : i32
    %24 = arith.extui %23 : i1 to i32
    %c0_i32_17 = arith.constant 0 : i32
    %25 = arith.cmpi ne, %24, %c0_i32_17 : i32
    scf.if %25 {
      %c0_18 = arith.constant 0 : index
      %c0_19 = arith.constant 0 : index
      %26 = vector.load %arg11[%c0_18, %c0_19] : memref<16x32xf32, #tpu.memory_space<vmem>>, vector<16x32xf32>
      %c0_20 = arith.constant 0 : index
      %c0_21 = arith.constant 0 : index
      %27 = vector.load %arg6[%c0_20, %c0_21] : memref<1x32xf32, #tpu.memory_space<vmem>>, vector<1x32xf32>
      %28 = vector.broadcast %27 : vector<1x32xf32> to vector<16x32xf32>
      %29 = arith.addf %26, %28 : vector<16x32xf32>
      %c0_22 = arith.constant 0 : index
      %c0_23 = arith.constant 0 : index
      %30 = vector.load %arg7[%c0_22, %c0_23] : memref<16x32xbf16, #tpu.memory_space<vmem>>, vector<16x32xbf16>
      %31 = arith.extf %30 : vector<16x32xbf16> to vector<16x32xf32>
      %32 = arith.addf %29, %31 : vector<16x32xf32>
      %cst_24 = arith.constant dense<0.000000e+00> : vector<16xf32>
      %33 = vector.multi_reduction <add>, %32, %cst_24 [1] : vector<16x32xf32> to vector<16xf32>
      %34 = vector.shape_cast %33 : vector<16xf32> to vector<16x1xf32>
      %cst_25 = arith.constant 3.200000e+01 : f32
      %35 = vector.broadcast %cst_25 : f32 to vector<16x1xf32>
      %36 = arith.divf %34, %35 : vector<16x1xf32>
      %37 = vector.broadcast %36 : vector<16x1xf32> to vector<16x32xf32>
      %38 = arith.subf %32, %37 : vector<16x32xf32>
      %39 = vector.broadcast %36 : vector<16x1xf32> to vector<16x32xf32>
      %40 = arith.subf %32, %39 : vector<16x32xf32>
      %41 = arith.mulf %38, %40 : vector<16x32xf32>
      %cst_26 = arith.constant dense<0.000000e+00> : vector<16xf32>
      %42 = vector.multi_reduction <add>, %41, %cst_26 [1] : vector<16x32xf32> to vector<16xf32>
      %43 = vector.shape_cast %42 : vector<16xf32> to vector<16x1xf32>
      %cst_27 = arith.constant 3.200000e+01 : f32
      %44 = vector.broadcast %cst_27 : f32 to vector<16x1xf32>
      %45 = arith.divf %43, %44 : vector<16x1xf32>
      %46 = vector.broadcast %36 : vector<16x1xf32> to vector<16x32xf32>
      %47 = arith.subf %32, %46 : vector<16x32xf32>
      %cst_28 = arith.constant 9.99999996E-13 : f32
      %48 = vector.broadcast %cst_28 : f32 to vector<16x1xf32>
      %49 = arith.addf %45, %48 : vector<16x1xf32>
      %50 = math.rsqrt %49 : vector<16x1xf32>
      %51 = vector.broadcast %50 : vector<16x1xf32> to vector<16x32xf32>
      %52 = arith.mulf %47, %51 : vector<16x32xf32>
      %c0_29 = arith.constant 0 : index
      %c0_30 = arith.constant 0 : index
      %53 = vector.load %arg8[%c0_29, %c0_30] : memref<1x32xf32, #tpu.memory_space<vmem>>, vector<1x32xf32>
      %54 = vector.broadcast %53 : vector<1x32xf32> to vector<16x32xf32>
      %55 = arith.mulf %52, %54 : vector<16x32xf32>
      %c0_31 = arith.constant 0 : index
      %c0_32 = arith.constant 0 : index
      %56 = vector.load %arg9[%c0_31, %c0_32] : memref<1x32xf32, #tpu.memory_space<vmem>>, vector<1x32xf32>
      %57 = vector.broadcast %56 : vector<1x32xf32> to vector<16x32xf32>
      %58 = arith.addf %55, %57 : vector<16x32xf32>
      %59 = arith.truncf %58 : vector<16x32xf32> to vector<16x32xbf16>
      %c0_33 = arith.constant 0 : index
      %c0_34 = arith.constant 0 : index
      %60 = vector.load %arg10[%c0_33, %c0_34] : memref<16x32xbf16, #tpu.memory_space<vmem>>, vector<16x32xbf16>
      tpu.vector_store %arg10[%c0_33, %c0_34], %59 {strides = array<i32>} : memref<16x32xbf16, #tpu.memory_space<vmem>>, vector<16x32xbf16>,
    } else {
    }
    return
  }
  func.func @transform_0(%arg0: i32, %arg1: i32) -> (i32, i32) {
    %c0_i32 = arith.constant 0 : i32
    %c0_i32_0 = arith.constant 0 : i32
    return %arg0, %c0_i32 : i32, i32
  }
  func.func @transform_1(%arg0: i32, %arg1: i32) -> (i32, i32) {
    %c0_i32 = arith.constant 0 : i32
    %c0_i32_0 = arith.constant 0 : i32
    return %c0_i32, %arg1 : i32, i32
  }
  func.func @transform_2(%arg0: i32, %arg1: i32) -> (i32, i32) {
    %c0_i32 = arith.constant 0 : i32
    %c0_i32_0 = arith.constant 0 : i32
    return %c0_i32, %arg1 : i32, i32
  }
  func.func @transform_3(%arg0: i32, %arg1: i32) -> (i32, i32) {
    %c0_i32 = arith.constant 0 : i32
    %c0_i32_0 = arith.constant 0 : i32
    return %arg1, %c0_i32 : i32, i32
  }
  func.func @transform_4(%arg0: i32, %arg1: i32) -> (i32, i32) {
    %c0_i32 = arith.constant 0 : i32
    %c0_i32_0 = arith.constant 0 : i32
    %c0_i32_1 = arith.constant 0 : i32
    return %c0_i32, %c0_i32_0 : i32, i32
  }
  func.func @transform_5(%arg0: i32, %arg1: i32) -> (i32, i32) {
    %c0_i32 = arith.constant 0 : i32
    %c0_i32_0 = arith.constant 0 : i32
    return %arg0, %c0_i32 : i32, i32
  }
  func.func @transform_6(%arg0: i32, %arg1: i32) -> (i32, i32) {
    %c0_i32 = arith.constant 0 : i32
    %c0_i32_0 = arith.constant 0 : i32
    %c0_i32_1 = arith.constant 0 : i32
    return %c0_i32, %c0_i32_0 : i32, i32
  }
  func.func @transform_7(%arg0: i32, %arg1: i32) -> (i32, i32) {
    %c0_i32 = arith.constant 0 : i32
    %c0_i32_0 = arith.constant 0 : i32
    %c0_i32_1 = arith.constant 0 : i32
    return %c0_i32, %c0_i32_0 : i32, i32
  }
  func.func @transform_8(%arg0: i32, %arg1: i32) -> (i32, i32) {
    %c0_i32 = arith.constant 0 : i32
    %c0_i32_0 = arith.constant 0 : i32
    return %arg0, %c0_i32 : i32, i32
  }
}

module attributes {stable_mosaic.version = 11 : i64} {
  func.func @_ffn_kernel(%arg0: i32, %arg1: i32, %arg2: memref<16x32xbf16, #tpu.memory_space<vmem>>, %arg3: memref<32x64xbf16, #tpu.memory_space<vmem>>, %arg4: memref<1x64xf32, #tpu.memory_space<vmem>>, %arg5: memref<64x32xbf16, #tpu.memory_space<vmem>>, %arg6: memref<1x32xf32, #tpu.memory_space<vmem>>, %arg7: memref<16x32xbf16, #tpu.memory_space<vmem>>, %arg8: memref<1x32xf32, #tpu.memory_space<vmem>>, %arg9: memref<1x32xf32, #tpu.memory_space<vmem>>, %arg10: memref<16x32xbf16, #tpu.memory_space<vmem>>, %arg11: memref<16x32xf32, #tpu.memory_space<vmem>>) attributes {dimension_semantics = [#tpu.dimension_semantics<parallel>, #tpu.dimension_semantics<arbitrary>], iteration_bounds = array<i64: 1, 1>, scalar_prefetch = 0 : i64, scratch_operands = 1 : i64, tpu.core_type = #tpu.core_type<tc>, window_params = [{transform_indices = @transform_0, window_bounds = array<i64: 16, 32>}, {transform_indices = @transform_1, window_bounds = array<i64: 32, 64>}, {transform_indices = @transform_2, window_bounds = array<i64: 1, 64>}, {transform_indices = @transform_3, window_bounds = array<i64: 64, 32>}, {pipeline_mode = #tpu.pipeline_mode<synchronous>, transform_indices = @transform_4, window_bounds = array<i64: 1, 32>}, {transform_indices = @transform_5, window_bounds = array<i64: 16, 32>}, {pipeline_mode = #tpu.pipeline_mode<synchronous>, transform_indices = @transform_6, window_bounds = array<i64: 1, 32>}, {pipeline_mode = #tpu.pipeline_mode<synchronous>, transform_indices = @transform_7, window_bounds = array<i64: 1, 32>}, {transform_indices = @transform_8, window_bounds = array<i64: 16, 32>}]} {
    %c0_i32 = arith.constant 0 : i32
    %0 = arith.cmpi eq, %arg1, %c0_i32 : i32
    %1 = arith.extui %0 : i1 to i32
    %c0_i32_0 = arith.constant 0 : i32
    %2 = arith.cmpi ne, %1, %c0_i32_0 : i32
    scf.if %2 {
      %cst_18 = arith.constant 0.000000e+00 : f32
      %26 = vector.broadcast %cst_18 : f32 to vector<16x32xf32>
      %c0_19 = arith.constant 0 : index
      %c0_20 = arith.constant 0 : index
      %27 = vector.load %arg11[%c0_19, %c0_20] : memref<16x32xf32, #tpu.memory_space<vmem>>, vector<16x32xf32>
      tpu.vector_store %arg11[%c0_19, %c0_20], %26 {strides = array<i32>} : memref<16x32xf32, #tpu.memory_space<vmem>>, vector<16x32xf32>,
    } else {
    }
    %c0 = arith.constant 0 : index
    %c0_1 = arith.constant 0 : index
    %3 = vector.load %arg2[%c0, %c0_1] : memref<16x32xbf16, #tpu.memory_space<vmem>>, vector<16x32xbf16>
    %c0_2 = arith.constant 0 : index
    %c0_3 = arith.constant 0 : index
    %4 = vector.load %arg3[%c0_2, %c0_3] : memref<32x64xbf16, #tpu.memory_space<vmem>>, vector<32x64xbf16>
    %cst = arith.constant dense<0.000000e+00> : vector<16x64xf32>
    %5 = tpu.matmul %3, %4, %cst {dimension_numbers = #tpu.dot_dimension_numbers<[1], [0], [0], [1], [0, 0, 1, 1], [], []>} : vector<16x32xbf16>, vector<32x64xbf16>, vector<16x64xf32> -> vector<16x64xf32>
    %c0_4 = arith.constant 0 : index
    %c0_5 = arith.constant 0 : index
    %6 = vector.load %arg4[%c0_4, %c0_5] : memref<1x64xf32, #tpu.memory_space<vmem>>, vector<1x64xf32>
    %7 = vector.broadcast %6 : vector<1x64xf32> to vector<16x64xf32>
    %8 = arith.addf %5, %7 : vector<16x64xf32>
    %cst_6 = arith.constant 5.000000e-01 : f32
    %9 = vector.broadcast %cst_6 : f32 to vector<16x64xf32>
    %10 = arith.mulf %8, %9 : vector<16x64xf32>
    %cst_7 = arith.constant 0.707106769 : f32
    %11 = vector.broadcast %cst_7 : f32 to vector<16x64xf32>
    %12 = arith.mulf %8, %11 : vector<16x64xf32>
    %13 = math.erf %12 : vector<16x64xf32>
    %cst_8 = arith.constant 1.000000e+00 : f32
    %14 = vector.broadcast %cst_8 : f32 to vector<16x64xf32>
    %15 = arith.addf %14, %13 : vector<16x64xf32>
    %16 = arith.mulf %10, %15 : vector<16x64xf32>
    %c0_9 = arith.constant 0 : index
    %c0_10 = arith.constant 0 : index
    %17 = vector.load %arg11[%c0_9, %c0_10] : memref<16x32xf32, #tpu.memory_space<vmem>>, vector<16x32xf32>
    %18 = arith.truncf %16 : vector<16x64xf32> to vector<16x64xbf16>
    %c0_11 = arith.constant 0 : index
    %c0_12 = arith.constant 0 : index
    %19 = vector.load %arg5[%c0_11, %c0_12] : memref<64x32xbf16, #tpu.memory_space<vmem>>, vector<64x32xbf16>
    %cst_13 = arith.constant dense<0.000000e+00> : vector<16x32xf32>
    %20 = tpu.matmul %18, %19, %cst_13 {dimension_numbers = #tpu.dot_dimension_numbers<[1], [0], [0], [1], [0, 0, 1, 1], [], []>} : vector<16x64xbf16>, vector<64x32xbf16>, vector<16x32xf32> -> vector<16x32xf32>
    %21 = arith.addf %17, %20 : vector<16x32xf32>
    %c0_14 = arith.constant 0 : index
    %c0_15 = arith.constant 0 : index
    %22 = vector.load %arg11[%c0_14, %c0_15] : memref<16x32xf32, #tpu.memory_space<vmem>>, vector<16x32xf32>
    tpu.vector_store %arg11[%c0_14, %c0_15], %21 {strides = array<i32>} : memref<16x32xf32, #tpu.memory_space<vmem>>, vector<16x32xf32>,
    %c0_i32_16 = arith.constant 0 : i32
    %23 = arith.cmpi eq, %arg1, %c0_i32_16 : i32
    %24 = arith.extui %23 : i1 to i32
    %c0_i32_17 = arith.constant 0 : i32
    %25 = arith.cmpi ne, %24, %c0_i32_17 : i32
    scf.if %25 {
      %c0_18 = arith.constant 0 : index
      %c0_19 = arith.constant 0 : index
      %26 = vector.load %arg11[%c0_18, %c0_19] : memref<16x32xf32, #tpu.memory_space<vmem>>, vector<16x32xf32>
      %c0_20 = arith.constant 0 : index
      %c0_21 = arith.constant 0 : index
      %27 = vector.load %arg6[%c0_20, %c0_21] : memref<1x32xf32, #tpu.memory_space<vmem>>, vector<1x32xf32>
      %28 = vector.broadcast %27 : vector<1x32xf32> to vector<16x32xf32>
      %29 = arith.addf %26, %28 : vector<16x32xf32>
      %c0_22 = arith.constant 0 : index
      %c0_23 = arith.constant 0 : index
      %30 = vector.load %arg7[%c0_22, %c0_23] : memref<16x32xbf16, #tpu.memory_space<vmem>>, vector<16x32xbf16>
      %31 = arith.extf %30 : vector<16x32xbf16> to vector<16x32xf32>
      %32 = arith.addf %29, %31 : vector<16x32xf32>
      %cst_24 = arith.constant dense<0.000000e+00> : vector<16xf32>
      %33 = vector.multi_reduction <add>, %32, %cst_24 [1] : vector<16x32xf32> to vector<16xf32>
      %34 = vector.shape_cast %33 : vector<16xf32> to vector<16x1xf32>
      %cst_25 = arith.constant 3.200000e+01 : f32
      %35 = vector.broadcast %cst_25 : f32 to vector<16x1xf32>
      %36 = arith.divf %34, %35 : vector<16x1xf32>
      %37 = vector.broadcast %36 : vector<16x1xf32> to vector<16x32xf32>
      %38 = arith.subf %32, %37 : vector<16x32xf32>
      %39 = vector.broadcast %36 : vector<16x1xf32> to vector<16x32xf32>
      %40 = arith.subf %32, %39 : vector<16x32xf32>
      %41 = arith.mulf %38, %40 : vector<16x32xf32>
      %cst_26 = arith.constant dense<0.000000e+00> : vector<16xf32>
      %42 = vector.multi_reduction <add>, %41, %cst_26 [1] : vector<16x32xf32> to vector<16xf32>
      %43 = vector.shape_cast %42 : vector<16xf32> to vector<16x1xf32>
      %cst_27 = arith.constant 3.200000e+01 : f32
      %44 = vector.broadcast %cst_27 : f32 to vector<16x1xf32>
      %45 = arith.divf %43, %44 : vector<16x1xf32>
      %46 = vector.broadcast %36 : vector<16x1xf32> to vector<16x32xf32>
      %47 = arith.subf %32, %46 : vector<16x32xf32>
      %cst_28 = arith.constant 9.99999996E-13 : f32
      %48 = vector.broadcast %cst_28 : f32 to vector<16x1xf32>
      %49 = arith.addf %45, %48 : vector<16x1xf32>
      %50 = math.rsqrt %49 : vector<16x1xf32>
      %51 = vector.broadcast %50 : vector<16x1xf32> to vector<16x32xf32>
      %52 = arith.mulf %47, %51 : vector<16x32xf32>
      %c0_29 = arith.constant 0 : index
      %c0_30 = arith.constant 0 : index
      %53 = vector.load %arg8[%c0_29, %c0_30] : memref<1x32xf32, #tpu.memory_space<vmem>>, vector<1x32xf32>
      %54 = vector.broadcast %53 : vector<1x32xf32> to vector<16x32xf32>
      %55 = arith.mulf %52, %54 : vector<16x32xf32>
      %c0_31 = arith.constant 0 : index
      %c0_32 = arith.constant 0 : index
      %56 = vector.load %arg9[%c0_31, %c0_32] : memref<1x32xf32, #tpu.memory_space<vmem>>, vector<1x32xf32>
      %57 = vector.broadcast %56 : vector<1x32xf32> to vector<16x32xf32>
      %58 = arith.addf %55, %57 : vector<16x32xf32>
      %59 = arith.truncf %58 : vector<16x32xf32> to vector<16x32xbf16>
      %c0_33 = arith.constant 0 : index
      %c0_34 = arith.constant 0 : index
      %60 = vector.load %arg10[%c0_33, %c0_34] : memref<16x32xbf16, #tpu.memory_space<vmem>>, vector<16x32xbf16>
      tpu.vector_store %arg10[%c0_33, %c0_34], %59 {strides = array<i32>} : memref<16x32xbf16, #tpu.memory_space<vmem>>, vector<16x32xbf16>,
    } else {
    }
    return
  }
  func.func @transform_0(%arg0: i32, %arg1: i32) -> (i32, i32) {
    %c0_i32 = arith.constant 0 : i32
    %c0_i32_0 = arith.constant 0 : i32
    return %arg0, %c0_i32 : i32, i32
  }
  func.func @transform_1(%arg0: i32, %arg1: i32) -> (i32, i32) {
    %c0_i32 = arith.constant 0 : i32
    %c0_i32_0 = arith.constant 0 : i32
    return %c0_i32, %arg1 : i32, i32
  }
  func.func @transform_2(%arg0: i32, %arg1: i32) -> (i32, i32) {
    %c0_i32 = arith.constant 0 : i32
    %c0_i32_0 = arith.constant 0 : i32
    return %c0_i32, %arg1 : i32, i32
  }
  func.func @transform_3(%arg0: i32, %arg1: i32) -> (i32, i32) {
    %c0_i32 = arith.constant 0 : i32
    %c0_i32_0 = arith.constant 0 : i32
    return %arg1, %c0_i32 : i32, i32
  }
  func.func @transform_4(%arg0: i32, %arg1: i32) -> (i32, i32) {
    %c0_i32 = arith.constant 0 : i32
    %c0_i32_0 = arith.constant 0 : i32
    %c0_i32_1 = arith.constant 0 : i32
    return %c0_i32, %c0_i32_0 : i32, i32
  }
  func.func @transform_5(%arg0: i32, %arg1: i32) -> (i32, i32) {
    %c0_i32 = arith.constant 0 : i32
    %c0_i32_0 = arith.constant 0 : i32
    return %arg0, %c0_i32 : i32, i32
  }
  func.func @transform_6(%arg0: i32, %arg1: i32) -> (i32, i32) {
    %c0_i32 = arith.constant 0 : i32
    %c0_i32_0 = arith.constant 0 : i32
    %c0_i32_1 = arith.constant 0 : i32
    return %c0_i32, %c0_i32_0 : i32, i32
  }
  func.func @transform_7(%arg0: i32, %arg1: i32) -> (i32, i32) {
    %c0_i32 = arith.constant 0 : i32
    %c0_i32_0 = arith.constant 0 : i32
    %c0_i32_1 = arith.constant 0 : i32
    return %c0_i32, %c0_i32_0 : i32, i32
  }
  func.func @transform_8(%arg0: i32, %arg1: i32) -> (i32, i32) {
    %c0_i32 = arith.constant 0 : i32
    %c0_i32_0 = arith.constant 0 : i32
    return %arg0, %c0_i32 : i32, i32
  }
}

</mosaic_0001>

<bundles_post_ra>
// kernel: bert_encoder.19
= control target key start
LH: loop header
LB: loop body
LE: loop exit
PB: predicated region body
PF: predicated region fallthrough
CT: control target
= control target key end

     0   :  { %v130_v0 = vmov 0.0   ;;  %vm131_vm0 = vmmov 0   ;;  %vm45_vm1 = vcmask 261120   ;;  %vm98_vm2 = vcmask 519168   ;;  %s170_s1 = inlined_call_operand.vmem [shape: bf16[32,64], index: 1, kind: input, shape index: {}]   ;;  %s171_s0 = inlined_call_operand.vmem [shape: bf16[16,32], index: 0, kind: input, shape index: {}]   ;;  %s172_s2 = inlined_call_operand.vmem [shape: f32[1,64], index: 2, kind: input, shape index: {}]   ;;  %s173_s3 = inlined_call_operand.vmem [shape: bf16[16,64], index: 3, kind: output, shape index: {}]  }
   0x1   :  { %117 = vmatprep.subr.bf16.mxu0 %v130_v0  ;;  %v127_v1 = vld [vmem:[%s170_s1 + $0x8] sm:$0xff]   ;;  %121 = vmatprep.mubr.msk.bf16.mxu0 %vm131_vm0, %v130_v0  ;;  %v128_v2 = vld [vmem:[%s170_s1] sm:$0xff]  }
   0x2   :  { %118 = vmatpush3.bf16.msra.mxu0 %v127_v1  ;;  %v129_v3 = vld [vmem:[%s171_s0] sm:$0xff]  }
   0x3   :  { %119 = vmatprep.subr.bf16.mxu0 %v130_v0  ;;  %v105_v4 = vld [vmem:[%s172_s2] ss:$0 sm:$0xff] }
   0x6   :  { %120 = vmatpush3.bf16.msra.mxu0 %v128_v2 }
   0x9   :  { %122 = vmatmul.mubr.msk.bf16.vlgmr.msra.gmra.mxu0 %vm45_vm1, %v129_v3 }
  0xc9   :  { %v83_v5 = vpop.f32.mrf.mxu0 }
  0xca   :  { %v84_v6 = vadd.f32 %v105_v4, %v83_v5 }
  0xcb   :  { %v123_v7 = vpop.f32.mrf.mxu0 }
  0xcc   :  { %v112_v8 = vpack.c.bf16 %v84_v6, %v84_v6 }
  0xcd   :  { %v86_v9 = vpop.f32.mrf.mxu0 }
  0xce   :  { %99 = vst.msk [vmem:[%s173_s3] sm:$0xf] %vm98_vm2, %v112_v8  ;;  %v87_v10 = vadd.f32 %v105_v4, %v86_v9 }
  0xcf   :  { %v124_v11 = vpop.f32.mrf.mxu0 }
  0xd0   :  { %v113_v12 = vpack.c.bf16 %v87_v10, %v87_v10 }
  0xd2   :  { %100 = vst.msk [vmem:[%s173_s3 + $0x4] sm:$0xf] %vm98_vm2, %v113_v12 }

// kernel: bert_encoder.18
= control target key start
LH: loop header
LB: loop body
LE: loop exit
PB: predicated region body
PF: predicated region fallthrough
CT: control target
= control target key end

     0   :  { %v130_v0 = vmov 0.0   ;;  %vm131_vm0 = vmmov 0   ;;  %vm45_vm1 = vcmask 261120   ;;  %vm98_vm2 = vcmask 257024   ;;  %s170_s1 = inlined_call_operand.vmem [shape: bf16[32,32], index: 1, kind: input, shape index: {}]   ;;  %s171_s0 = inlined_call_operand.vmem [shape: bf16[16,32], index: 0, kind: input, shape index: {}]   ;;  %s172_s2 = inlined_call_operand.vmem [shape: f32[1,32], index: 2, kind: input, shape index: {}]   ;;  %s173_s3 = inlined_call_operand.vmem [shape: bf16[16,32], index: 3, kind: output, shape index: {}]  }
   0x1   :  { %117 = vmatprep.subr.bf16.mxu0 %v130_v0  ;;  %v127_v1 = vld [vmem:[%s170_s1 + $0x8] sm:$0xff]   ;;  %121 = vmatprep.mubr.msk.bf16.mxu0 %vm131_vm0, %v130_v0  ;;  %v128_v2 = vld [vmem:[%s170_s1] sm:$0xff]  }
   0x2   :  { %118 = vmatpush3.bf16.msra.mxu0 %v127_v1  ;;  %v129_v3 = vld [vmem:[%s171_s0] sm:$0xff]  }
   0x3   :  { %119 = vmatprep.subr.bf16.mxu0 %v130_v0  ;;  %v105_v4 = vld [vmem:[%s172_s2] ss:$0 sm:$0xff] }
   0x6   :  { %120 = vmatpush3.bf16.msra.mxu0 %v128_v2 }
   0x9   :  { %122 = vmatmul.mubr.msk.bf16.vlgmr.msra.gmra.mxu0 %vm45_vm1, %v129_v3 }
  0xc9   :  { %v83_v5 = vpop.f32.mrf.mxu0 }
  0xca   :  { %v84_v6 = vadd.f32 %v105_v4, %v83_v5 }
  0xcb   :  { %v123_v7 = vpop.f32.mrf.mxu0 }
  0xcc   :  { %v112_v8 = vpack.c.bf16 %v84_v6, %v84_v6 }
  0xcd   :  { %v86_v9 = vpop.f32.mrf.mxu0 }
  0xce   :  { %99 = vst.msk [vmem:[%s173_s3] sm:$0xf] %vm98_vm2, %v112_v8  ;;  %v87_v10 = vadd.f32 %v105_v4, %v86_v9 }
  0xcf   :  { %v124_v11 = vpop.f32.mrf.mxu0 }
  0xd0   :  { %v113_v12 = vpack.c.bf16 %v87_v10, %v87_v10 }
  0xd2   :  { %100 = vst.msk [vmem:[%s173_s3 + $0x4] sm:$0xf] %vm98_vm2, %v113_v12 }

// kernel: bert_encoder.21
= control target key start
LH: loop header
LB: loop body
LE: loop exit
PB: predicated region body
PF: predicated region fallthrough
CT: control target
= control target key end

     0   :  { %v200_v0 = vmov 0.0   ;;  %vm201_vm0 = vmmov 0   ;;  %vm54_vm1 = vcmask 261120   ;;  %vm158_vm2 = vcmask 257024   ;;  %s269_s1 = inlined_call_operand.vmem [shape: bf16[32,32], index: 1, kind: input, shape index: {}]   ;;  %s270_s0 = inlined_call_operand.vmem [shape: bf16[16,32], index: 0, kind: input, shape index: {}]   ;;  %s271_s3 = inlined_call_operand.vmem [shape: bf16[16,32], index: 3, kind: input, shape index: {}]   ;;  %s272_s2 = inlined_call_operand.vmem [shape: f32[1,32], index: 2, kind: input, shape index: {}]   ;;  %s273_s4 = inlined_call_operand.vmem [shape: f32[1,32], index: 4, kind: input, shape index: {}]   ;;  %s274_s5 = inlined_call_operand.vmem [shape: f32[1,32], index: 5, kind: input, shape index: {}]   ;;  %s275_s6 = inlined_call_operand.vmem [shape: bf16[16,32], index: 6, kind: output, shape index: {}]  }
   0x1   :  { %183 = vmatprep.subr.bf16.mxu0 %v200_v0  ;;  %v193_v1 = vld [vmem:[%s269_s1 + $0x8] sm:$0xff]   ;;  %187 = vmatprep.mubr.msk.bf16.mxu0 %vm201_vm0, %v200_v0  ;;  %v194_v2 = vld [vmem:[%s269_s1] sm:$0xff]  }
   0x2   :  { %184 = vmatpush3.bf16.msra.mxu0 %v193_v1  ;;  %v195_v3 = vld [vmem:[%s270_s0] sm:$0xff]  }
   0x3   :  { %185 = vmatprep.subr.bf16.mxu0 %v200_v0  ;;  %v177_v4 = vld [vmem:[%s271_s3] sm:$0xff]  }
   0x4   :  { %v165_v5 = vld [vmem:[%s272_s2] ss:$0 sm:$0xff]  ;;  %v178_v6 = vunpack.c.l.bf16 %v177_v4  ;;  %v179_v11 = vunpack.c.h.bf16 %v177_v4 }
   0x5   :  { %v170_v35 = vld [vmem:[%s273_s4] ss:$0 sm:$0xff] }
   0x6   :  { %186 = vmatpush3.bf16.msra.mxu0 %v194_v2  ;;  %v171_v37 = vld [vmem:[%s274_s5] ss:$0 sm:$0xff] }
   0x9   :  { %188 = vmatmul.mubr.msk.bf16.vlgmr.msra.gmra.mxu0 %vm54_vm1, %v195_v3 }
  0xc9   :  { %v92_v7 = vpop.f32.mrf.mxu0 }
  0xca   :  { %v93_v8 = vadd.f32 %v165_v5, %v92_v7 }
  0xcb   :  { %v189_v9 = vpop.f32.mrf.mxu0 }
  0xcc   :  { %v103_v10 = vadd.f32 %v178_v6, %v93_v8 }
  0xcd   :  { %v95_v12 = vpop.f32.mrf.mxu0 }
  0xce   :  { %v96_v13 = vadd.f32 %v165_v5, %v95_v12  ;;  %v105_v14 = vsel %vm54_vm1, %v103_v10, 0.0 }
  0xcf   :  { %106 = vadd.xlane.f32.xlu0 %v105_v14  ;;  %v190_v15 = vpop.f32.mrf.mxu0 }
  0xd0   :  { %v104_v16 = vadd.f32 %v179_v11, %v96_v13 }
  0xd2   :  { %v108_v17 = vsel %vm54_vm1, %v104_v16, 0.0 }
  0xd3   :  { %109 = vadd.xlane.f32.xlu0 %v108_v17 }
 0x158   :  { %v107_v18 = vpop.xlane.xlu0 %106 }
 0x159   :  { %v112_v19 = vmul.f32 0.03125, %v107_v18 }
 0x15b   :  { %v114_v20 = vsub.f32 %v103_v10, %v112_v19 }
 0x15c   :  { %v110_v21 = vpop.xlane.xlu0 %109 }
 0x15d   :  { %v113_v22 = vmul.f32 0.03125, %v110_v21  ;;  %v116_v23 = vmul.f32 %v114_v20, %v114_v20 }
 0x15f   :  { %v115_v24 = vsub.f32 %v104_v16, %v113_v22  ;;  %v118_v25 = vsel %vm54_vm1, %v116_v23, 0.0 }
 0x160   :  { %119 = vadd.xlane.f32.xlu1 %v118_v25 }
 0x161   :  { %v117_v26 = vmul.f32 %v115_v24, %v115_v24 }
 0x163   :  { %v121_v27 = vsel %vm54_vm1, %v117_v26, 0.0 }
 0x164   :  { %122 = vadd.xlane.f32.xlu1 %v121_v27 }
 0x1e9   :  { %v120_v28 = vpop.xlane.xlu1 %119 }
 0x1ea   :  { %v124_v29 = vmul.f32 0.03125, %v120_v28 }
 0x1ec   :  { %v126_v30 = vadd.f32 1e-12, %v124_v29 }
 0x1ed   :  { %v123_v31 = vpop.xlane.xlu1 %122 }
 0x1ee   :  { %196 = vrsqrt.f32 %v126_v30  ;;  %v125_v32 = vmul.f32 0.03125, %v123_v31 }
 0x1f0   :  { %v127_v33 = vadd.f32 1e-12, %v125_v32 }
 0x1f2   :  { %198 = vrsqrt.f32 %v127_v33 }
 0x1fb   :  { %v197_v34 = vpop.eup %196 }
 0x1fc   :  { %v130_v36 = vmul.f32 %v197_v34, %v114_v20 }
 0x1fe   :  { %v139_v38 = vmul.f32 %v170_v35, %v130_v36 }
 0x1ff   :  { %v199_v39 = vpop.eup %198 }
 0x200   :  { %v148_v40 = vadd.f32 %v171_v37, %v139_v38  ;;  %v131_v41 = vmul.f32 %v199_v39, %v115_v24 }
 0x202   :  { %v174_v42 = vpack.c.bf16 %v148_v40, %v148_v40  ;;  %v140_v43 = vmul.f32 %v170_v35, %v131_v41 }
 0x204   :  { %159 = vst.msk [vmem:[%s275_s6] sm:$0xf] %vm158_vm2, %v174_v42  ;;  %v149_v44 = vadd.f32 %v171_v37, %v140_v43 }
 0x206   :  { %v175_v45 = vpack.c.bf16 %v149_v44, %v149_v44 }
 0x208   :  { %160 = vst.msk [vmem:[%s275_s6 + $0x4] sm:$0xf] %vm158_vm2, %v175_v45 }

// kernel: bert_encoder.20
= control target key start
LH: loop header
LB: loop body
LE: loop exit
PB: predicated region body
PF: predicated region fallthrough
CT: control target
= control target key end

     0   :  { %s1009_s12 = smov 0   ;;  %s1011_s13 = smov 0   ;;  %s1122_s0 = inlined_call_operand.vmem [shape: bf16[2,8,32], index: 0, kind: input, shape index: {}]   ;;  %s1123_s1 = inlined_call_operand.vmem [shape: bf16[2,8,64], index: 1, kind: input, shape index: {}]   ;;  %s1124_s2 = inlined_call_operand.vmem [shape: f32[2,1,1,8], index: 2, kind: input, shape index: {}]   ;;  %s1125_s3 = inlined_call_operand.vmem [shape: bf16[2,8,32], index: 3, kind: output, shape index: {}]  }
   0x1   :  { %s1013_s14 = smov 0  }
   0x2 LB: > { %s25_s15 = sadd.s32 1, %s971_s13  ;;  %p813_p0 = scmp.ge.s32.totalorder %s975_s14, 1  ;;  %s975_s14 = sphi %s1013_s14, %s13_s14   ;;  %s971_s13 = sphi %s1011_s13, %s1127_s13   ;;  %s967_s12 = sphi %s1009_s12, %s1126_s12  }
   0x3   : > { %p27_p1 = scmp.ge.s32.totalorder %s25_s15, 2  ;;  %p172_p2 = scmp.lt.s32.totalorder %s975_s14, 3 }
   0x5   : > { %s1129_s15 = smov (%p27_p1, %s25_s15), 0  ;;  %p173_p3 = pnand %p813_p0, %p172_p2 }
   0x6   : > { %p207_p4 = scmp.lt.s32.totalorder (!%p173_p3), %s967_s12, 1  ;;  %s979_s26 = smov (!%p173_p3), 96  }
   0x7   : > { %176 = sbr.rel (%p173_p3) target bundleno = 1377 (0x561), region = 32  ;;  %s980_s27 = smov (!%p173_p3), 120  }
   0x8   : > { %s981_s28 = smov (!%p173_p3), 112   ;;  %s982_s29 = smov (!%p173_p3), 104  }
   0x9   : > { %s983_s6 = smov (!%p173_p3), 88   ;;  %s984_s7 = smov (!%p173_p3), 72  }
   0xa   : > { %s985_s8 = smov (!%p173_p3), 80   ;;  %s986_s9 = smov (!%p173_p3), 8  }
   0xb   : > { %s987_s10 = smov (!%p173_p3), 16   ;;  %s988_s11 = smov (!%p173_p3), 24  }
   0xc   : > { %v977_v0 = vmov 0.0   ;;  %vm978_vm0 = vmmov 0   ;;  %s1131_s12 = smov (!%p207_p4, %s967_s12), 1  ;;  %vm240_vm1 = vcmask 64512   ;;  %vm307_vm2 = vcmask 1043456  }
   0xd   : > { %852 = vmatprep.subr.bf16.mxu0 %v977_v0  ;;  %854 = vmatprep.mubr.msk.bf16.mxu0 %vm978_vm0, %v977_v0  ;;  %s1033_s16 = sshll.u32 %s1131_s12, 2  ;;  %s220_s25 = scalar_lea.vmem %s1124_s2, %s1131_s12  ;;  %vm352_vm3 = vcmask 60416   ;;  %vm474_vm4 = vcmask 126016   ;;  %vm593_vm5 = vcmask 191616   ;;  %vm712_vm6 = vcmask 257216  }
   0xe   : > { %858 = vmatprep.subr.bf16.mxu1 %v977_v0  ;;  %860 = vmatprep.mubr.msk.bf16.mxu1 %vm978_vm0, %v977_v0  ;;  %s213_s19 = scalar_lea.vmem %s1122_s0, %s1033_s16  ;;  %s217_s22 = scalar_lea.vmem %s1123_s1, %s1033_s16  ;;  %v1051_v5 = vld [vmem:[%s220_s25] ss:$0 sm:$0xff] }
   0xf   : > { %v233_v1 = vld [vmem:[%s217_s22] sm:$0xf]  ;;  %s1083_s5 = scalar_lea.vmem %s1125_s3, %s1033_s16 }
  0x10   : > { %v245_v2 = vsel %vm240_vm1, %v233_v1, 0  ;;  %v231_v3 = vld [vmem:[%s213_s19] sm:$0xf]  ;;  %v1055_v12 = vcombine.low %v233_v1, %v233_v1 }
  0x11   : > { %853 = vmatpush3.bf16.xpose.msra.mxu0 %v245_v2  ;;  %v232_v4 = vmul.bf16 1052065461, %v231_v3 }
  0x12   : > { %870 = vmatprep.subr.bf16.mxu0 %v977_v0  ;;  %302 = vrot.lane.b32.xlu1 %v1055_v12, %s979_s26 }
  0x13   : > { %v821_v13 = vcombine.low %v232_v4, %v232_v4 }
  0x16   : > { %359 = vrot.lane.b32.xlu1 %v1055_v12, %s980_s27 }
  0x18   : > { %855 = vmatmul.mubr.msk.bf16.vlgmr.msra.gmra.mxu0 %vm240_vm1, %v232_v4 }
  0x19   : > { %872 = vmatprep.mubr.msk.bf16.mxu0 %vm978_vm0, %v977_v0 }
  0x1a   : > { %478 = vrot.lane.b32.xlu1 %v1055_v12, %s981_s28 }
  0x1e   : > { %476 = vrot.lane.b32.xlu1 %v821_v13, %s981_s28 }
  0x22   : > { %597 = vrot.lane.b32.xlu1 %v1055_v12, %s982_s29 }
  0x26   : > { %595 = vrot.lane.b32.xlu1 %v821_v13, %s982_s29 }
  0x84   : > { %v303_v19 = vpop.permute.xlu1 %302 }
  0x85   : > { %v309_v20 = vsel %vm307_vm2, %v303_v19, 0 }
  0x86   : > { %859 = vmatpush3.bf16.msra.mxu1 %v309_v20 }
  0x87   : > { %864 = vmatprep.subr.bf16.mxu1 %v977_v0 }
  0x88   : > { %v360_v23 = vpop.permute.xlu1 %359 }
  0x89   : > { %v365_v25 = vsel %vm240_vm1, %v360_v23, 0 }
  0x8c   : > { %v479_v27 = vpop.permute.xlu1 %478 }
  0x8d   : > { %v484_v30 = vsel %vm240_vm1, %v479_v27, 0 }
  0x90   : > { %v477_v29 = vpop.permute.xlu1 %476 }
  0x94   : > { %v598_v31 = vpop.permute.xlu1 %597 }
  0x95   : > { %v603_v32 = vsel %vm240_vm1, %v598_v31, 0 }
  0x98   : > { %v596_v33 = vpop.permute.xlu1 %595 }
  0xd8   : > { %v281_v6 = vpop.f32.mrf.mxu0 }
  0xd9   : > { %v282_v7 = vadd.f32 %v1051_v5, %v281_v6 }
  0xda   : > { %v856_v8 = vpop.f32.mrf.mxu0 }
  0xdb   : > { %v287_v9 = vsel %vm240_vm1, %v282_v7, -inf }
  0xdc   : > { %288 = vmax.xlane.f32.xlu0 %v287_v9  ;;  %v284_v10 = vpop.f32.mrf.mxu0 }
  0xde   : > { %v857_v11 = vpop.f32.mrf.mxu0 }
 0x165   : > { %v289_v14 = vpop.xlane.xlu0 %288 }
 0x166   : > { %v290_v15 = vsub.f32 %v282_v7, %v289_v14 }
 0x168   : > { %v291_v16 = vmul.f32 1.442695, %v290_v15 }
 0x16a   : > { %937 = vpow2.f32 %v291_v16 }
 0x177   : > { %v938_v17 = vpop.eup %937 }
 0x178   : > { %v293_v18 = vsel %vm240_vm1, %v938_v17, 0.0 }
 0x179   : > { %294 = vadd.xlane.f32.xlu0 %v293_v18 }
 0x18f   : > { %357 = vrot.lane.b32.xlu0 %v821_v13, %s980_s27 }
 0x202   : > { %v295_v21 = vpop.xlane.xlu0 %294 }
 0x203   : > { %939 = vrcp.f32 %v295_v21 }
 0x206   : > { %v358_v28 = vpop.permute.xlu0 %357 }
 0x210   : > { %v940_v22 = vpop.eup %939 }
 0x211   : > { %v297_v24 = vmul.f32 %v940_v22, %v938_v17 }
 0x213   : > { %v298_v26 = vpack.c.bf16 %v297_v24, %v297_v24 }
 0x215   : > { %861 = vmatmul.mubr.msk.bf16.vlgmr.msra.gmra.mxu1 %vm240_vm1, %v298_v26 }
 0x216   : > { %865 = vmatpush3.bf16.xpose.msra.mxu1 %v365_v25  ;;  %866 = vmatprep.mubr.msk.bf16.mxu1 %vm978_vm0, %v977_v0 }
 0x217   : > { %876 = vmatprep.subr.bf16.mxu1 %v977_v0 }
 0x21d   : > { %867 = vmatmul.mubr.msk.bf16.vlgmr.msra.gmra.mxu1 %vm240_vm1, %v358_v28 }
 0x21e   : > { %877 = vmatpush3.bf16.xpose.msra.mxu1 %v484_v30  ;;  %878 = vmatprep.mubr.msk.bf16.mxu1 %vm978_vm0, %v977_v0 }
 0x21f   : > { %888 = vmatprep.subr.bf16.mxu1 %v977_v0 }
 0x225   : > { %879 = vmatmul.mubr.msk.bf16.vlgmr.msra.gmra.mxu1 %vm240_vm1, %v477_v29 }
 0x226   : > { %889 = vmatpush3.bf16.xpose.msra.mxu1 %v603_v32  ;;  %890 = vmatprep.mubr.msk.bf16.mxu1 %vm978_vm0, %v977_v0 }
 0x22d   : > { %891 = vmatmul.mubr.msk.bf16.vlgmr.msra.gmra.mxu1 %vm240_vm1, %v596_v33 }
 0x2d5   : > { %v345_v34 = vpop.f32.mrf.mxu1 }
 0x2d6   : > { %v351_v35 = vpack.c.bf16 %v345_v34, %v345_v34 }
 0x2d7   : > { %v862_v36 = vpop.f32.mrf.mxu1 }
 0x2d8   : > { %353 = vst.msk [vmem:[%s1083_s5] sm:$0xf] %vm352_vm3, %v351_v35 }
 0x2d9   : > { %v348_v37 = vpop.f32.mrf.mxu1 }
 0x2db   : > { %v863_v38 = vpop.f32.mrf.mxu1 }
 0x2dd   : > { %v401_v39 = vpop.f32.mrf.mxu1 }
 0x2de   : > { %v402_v40 = vadd.f32 %v1051_v5, %v401_v39 }
 0x2df   : > { %v868_v41 = vpop.f32.mrf.mxu1 }
 0x2e0   : > { %v407_v42 = vsel %vm240_vm1, %v402_v40, -inf }
 0x2e1   : > { %408 = vmax.xlane.f32.xlu1 %v407_v42  ;;  %v404_v43 = vpop.f32.mrf.mxu1 }
 0x2e3   : > { %v869_v44 = vpop.f32.mrf.mxu1 }
 0x2e5   : > { %v520_v45 = vpop.f32.mrf.mxu1 }
 0x2e6   : > { %v521_v46 = vadd.f32 %v1051_v5, %v520_v45 }
 0x2e7   : > { %v880_v47 = vpop.f32.mrf.mxu1 }
 0x2e8   : > { %v526_v48 = vsel %vm240_vm1, %v521_v46, -inf }
 0x2e9   : > { %527 = vmax.xlane.f32.xlu0 %v526_v48  ;;  %v523_v49 = vpop.f32.mrf.mxu1 }
 0x2eb   : > { %v881_v50 = vpop.f32.mrf.mxu1 }
 0x2ed   : > { %v639_v51 = vpop.f32.mrf.mxu1 }
 0x2ee   : > { %v640_v52 = vadd.f32 %v1051_v5, %v639_v51 }
 0x2ef   : > { %v892_v53 = vpop.f32.mrf.mxu1 }
 0x2f0   : > { %v645_v54 = vsel %vm240_vm1, %v640_v52, -inf }
 0x2f1   : > { %646 = vmax.xlane.f32.xlu1 %v645_v54  ;;  %v642_v55 = vpop.f32.mrf.mxu1 }
 0x2f3   : > { %v893_v56 = vpop.f32.mrf.mxu1 }
 0x302   : > { %419 = vrot.lane.b32.xlu1 %v1055_v12, %s983_s6 }
 0x36a   : > { %v409_v57 = vpop.xlane.xlu1 %408 }
 0x36b   : > { %v410_v58 = vsub.f32 %v402_v40, %v409_v57 }
 0x36d   : > { %v411_v59 = vmul.f32 1.442695, %v410_v58 }
 0x36f   : > { %941 = vpow2.f32 %v411_v59 }
 0x372   : > { %v528_v60 = vpop.xlane.xlu0 %527 }
 0x373   : > { %v529_v61 = vsub.f32 %v521_v46, %v528_v60 }
 0x375   : > { %v530_v62 = vmul.f32 1.442695, %v529_v61 }
 0x377   : > { %943 = vpow2.f32 %v530_v62 }
 0x37a   : > { %v647_v63 = vpop.xlane.xlu1 %646 }
 0x37b   : > { %v648_v1 = vsub.f32 %v640_v52, %v647_v63 }
 0x37c   : > { %v942_v2 = vpop.eup %941 }
 0x37d   : > { %v649_v3 = vmul.f32 1.442695, %v648_v1  ;;  %v413_v4 = vsel %vm240_vm1, %v942_v2, 0.0 }
 0x37e   : > { %414 = vadd.xlane.f32.xlu0 %v413_v4  ;;  %v420_v5 = vpop.permute.xlu1 %419 }
 0x37f   : > { %945 = vpow2.f32 %v649_v3  ;;  %v425_v6 = vsel %vm307_vm2, %v420_v5, 0 }
 0x380   : > { %871 = vmatpush3.bf16.msra.mxu0 %v425_v6 }
 0x381   : > { %882 = vmatprep.subr.bf16.mxu0 %v977_v0 }
 0x384   : > { %v944_v7 = vpop.eup %943 }
 0x385   : > { %v532_v8 = vsel %vm240_vm1, %v944_v7, 0.0 }
 0x386   : > { %533 = vadd.xlane.f32.xlu1 %v532_v8 }
 0x38c   : > { %v946_v9 = vpop.eup %945 }
 0x38d   : > { %v651_v10 = vsel %vm240_vm1, %v946_v9, 0.0 }
 0x38e   : > { %652 = vadd.xlane.f32.xlu0 %v651_v10 }
 0x397   : > { %657 = vrot.lane.b32.xlu1 %v1055_v12, %s984_s7 }
 0x3a4   : > { %538 = vrot.lane.b32.xlu0 %v1055_v12, %s985_s8 }
 0x407   : > { %v415_v11 = vpop.xlane.xlu0 %414 }
 0x408   : > { %947 = vrcp.f32 %v415_v11 }
 0x40f   : > { %v534_v13 = vpop.xlane.xlu1 %533 }
 0x410   : > { %949 = vrcp.f32 %v534_v13 }
 0x413   : > { %v658_v12 = vpop.permute.xlu1 %657 }
 0x414   : > { %v663_v23 = vsel %vm307_vm2, %v658_v12, 0 }
 0x415   : > { %v948_v14 = vpop.eup %947 }
 0x416   : > { %v417_v15 = vmul.f32 %v948_v14, %v942_v2 }
 0x417   : > { %v653_v16 = vpop.xlane.xlu0 %652 }
 0x418   : > { %951 = vrcp.f32 %v653_v16  ;;  %v418_v17 = vpack.c.bf16 %v417_v15, %v417_v15 }
 0x41a   : > { %873 = vmatmul.mubr.msk.bf16.vlgmr.msra.gmra.mxu0 %vm240_vm1, %v418_v17 }
 0x41b   : > { %v539_v18 = vpop.permute.xlu0 %538  ;;  %884 = vmatprep.mubr.msk.bf16.mxu0 %vm978_vm0, %v977_v0 }
 0x41c   : > { %v544_v19 = vsel %vm307_vm2, %v539_v18, 0 }
 0x41d   : > { %v950_v20 = vpop.eup %949  ;;  %883 = vmatpush3.bf16.msra.mxu0 %v544_v19 }
 0x41e   : > { %v536_v21 = vmul.f32 %v950_v20, %v944_v7  ;;  %894 = vmatprep.subr.bf16.mxu0 %v977_v0 }
 0x420   : > { %v537_v22 = vpack.c.bf16 %v536_v21, %v536_v21 }
 0x422   : > { %885 = vmatmul.mubr.msk.bf16.vlgmr.msra.gmra.mxu0 %vm240_vm1, %v537_v22 }
 0x423   : > { %895 = vmatpush3.bf16.msra.mxu0 %v663_v23  ;;  %896 = vmatprep.mubr.msk.bf16.mxu0 %vm978_vm0, %v977_v0 }
 0x425   : > { %v952_v24 = vpop.eup %951 }
 0x426   : > { %v655_v25 = vmul.f32 %v952_v24, %v946_v9 }
 0x428   : > { %v656_v26 = vpack.c.bf16 %v655_v25, %v655_v25 }
 0x42a   : > { %897 = vmatmul.mubr.msk.bf16.vlgmr.msra.gmra.mxu0 %vm240_vm1, %v656_v26 }
 0x4da   : > { %v461_v27 = vpop.f32.mrf.mxu0 }
 0x4db   : > { %v833_v28 = vpack.c.bf16 %v461_v27, %v461_v27 }
 0x4dc   : > { %v874_v29 = vpop.f32.mrf.mxu0 }
 0x4dd   : > { %471 = vrot.lane.b32.xlu1 %v833_v28, %s986_s9 }
 0x4de   : > { %v464_v30 = vpop.f32.mrf.mxu0 }
 0x4e0   : > { %v875_v31 = vpop.f32.mrf.mxu0 }
 0x4e2   : > { %v580_v32 = vpop.f32.mrf.mxu0 }
 0x4e3   : > { %v834_v33 = vpack.c.bf16 %v580_v32, %v580_v32 }
 0x4e4   : > { %v886_v34 = vpop.f32.mrf.mxu0 }
 0x4e5   : > { %590 = vrot.lane.b32.xlu0 %v834_v33, %s987_s10 }
 0x4e6   : > { %v583_v0 = vpop.f32.mrf.mxu0 }
 0x4e8   : > { %v887_v35 = vpop.f32.mrf.mxu0 }
 0x4ea   : > { %v699_v36 = vpop.f32.mrf.mxu0 }
 0x4eb   : > { %v835_v37 = vpack.c.bf16 %v699_v36, %v699_v36 }
 0x4ec   : > { %v898_v38 = vpop.f32.mrf.mxu0 }
 0x4ed   : > { %709 = vrot.lane.b32.xlu1 %v835_v37, %s988_s11 }
 0x4ee   : > { %v702_v39 = vpop.f32.mrf.mxu0 }
 0x4f0   : > { %v899_v40 = vpop.f32.mrf.mxu0 }
 0x54f   : > { %v472_v41 = vpop.permute.xlu1 %471 }
 0x550   : > { %475 = vst.msk [vmem:[%s1083_s5] sm:$0xf] %vm474_vm4, %v472_v41 }
 0x557   : > { %v591_v42 = vpop.permute.xlu0 %590 }
 0x558   : > { %594 = vst.msk [vmem:[%s1083_s5] sm:$0xf] %vm593_vm5, %v591_v42 }
 0x55f   : > { %v710_v43 = vpop.permute.xlu1 %709 }
 0x560   : > { %713 = vst.msk [vmem:[%s1083_s5] sm:$0xf] %vm712_vm6, %v710_v43 }
 0x561 PF: > { %s13_s14 = sadd.s32 1, %s975_s14   ;;  %s1126_s12 = smov %s971_s13 }
 0x562   : > { %p10_p5 = scmp.ge.s32.totalorder %s13_s14, 4   ;;  %s1127_s13 = smov %s1129_s15 }
 0x564   :  { %12 = sbr.rel (!%p10_p5) target bundleno = 2 (0x2), region = 68 }

// kernel: bert_encoder.24
= control target key start
LH: loop header
LB: loop body
LE: loop exit
PB: predicated region body
PF: predicated region fallthrough
CT: control target
= control target key end

     0   :  { %s946_s9 = smov 0   ;;  %s948_s10 = smov 0   ;;  %s1050_s0 = inlined_call_operand.vmem [shape: bf16[2,8,32], index: 0, kind: input, shape index: {}]   ;;  %s1051_s1 = inlined_call_operand.vmem [shape: bf16[2,8,64], index: 1, kind: input, shape index: {}]   ;;  %s1052_s2 = inlined_call_operand.vmem [shape: bf16[2,8,32], index: 2, kind: output, shape index: {}]  }
   0x1   :  { %s950_s11 = smov 0  }
   0x2 LB: > { %s24_s12 = sadd.s32 1, %s913_s10  ;;  %p756_p0 = scmp.ge.s32.totalorder %s917_s11, 1  ;;  %s917_s11 = sphi %s950_s11, %s12_s11   ;;  %s913_s10 = sphi %s948_s10, %s1054_s10   ;;  %s909_s9 = sphi %s946_s9, %s1053_s9  }
   0x3   : > { %p26_p1 = scmp.ge.s32.totalorder %s24_s12, 2  ;;  %p139_p2 = scmp.lt.s32.totalorder %s917_s11, 3 }
   0x5   : > { %s1056_s12 = smov (%p26_p1, %s24_s12), 0  ;;  %p140_p3 = pnand %p756_p0, %p139_p2 }
   0x6   : > { %p169_p4 = scmp.lt.s32.totalorder (!%p140_p3), %s909_s9, 1  ;;  %s921_s20 = smov (!%p140_p3), 96  }
   0x7   : > { %143 = sbr.rel (%p140_p3) target bundleno = 1373 (0x55d), region = 28  ;;  %s922_s21 = smov (!%p140_p3), 120  }
   0x8   : > { %s923_s22 = smov (!%p140_p3), 112   ;;  %s924_s23 = smov (!%p140_p3), 104  }
   0x9   : > { %s925_s27 = smov (!%p140_p3), 88   ;;  %s926_s28 = smov (!%p140_p3), 72  }
   0xa   : > { %s927_s29 = smov (!%p140_p3), 80   ;;  %s928_s30 = smov (!%p140_p3), 8  }
   0xb   : > { %s929_s3 = smov (!%p140_p3), 16   ;;  %s930_s4 = smov (!%p140_p3), 24  }
   0xc   : > { %v919_v0 = vmov 0.0   ;;  %vm920_vm0 = vmmov 0   ;;  %s1058_s9 = smov (!%p169_p4, %s909_s9), 1  ;;  %vm192_vm1 = vcmask 64512   ;;  %vm259_vm2 = vcmask 1043456  }
   0xd   : > { %794 = vmatprep.subr.bf16.mxu0 %v919_v0  ;;  %796 = vmatprep.mubr.msk.bf16.mxu0 %vm920_vm0, %v919_v0  ;;  %s970_s13 = sshll.u32 %s1058_s9, 2  ;;  %vm304_vm3 = vcmask 60416   ;;  %vm426_vm4 = vcmask 126016   ;;  %vm545_vm5 = vcmask 191616   ;;  %vm664_vm6 = vcmask 257216  }
   0xe   : > { %800 = vmatprep.subr.bf16.mxu1 %v919_v0  ;;  %802 = vmatprep.mubr.msk.bf16.mxu1 %vm920_vm0, %v919_v0  ;;  %s175_s16 = scalar_lea.vmem %s1050_s0, %s970_s13  ;;  %s179_s19 = scalar_lea.vmem %s1051_s1, %s970_s13 }
   0xf   : > { %v191_v1 = vld [vmem:[%s179_s19] sm:$0xf]  ;;  %s1014_s26 = scalar_lea.vmem %s1052_s2, %s970_s13 }
  0x10   : > { %v197_v2 = vsel %vm192_vm1, %v191_v1, 0  ;;  %v189_v3 = vld [vmem:[%s175_s16] sm:$0xf]  ;;  %v986_v10 = vcombine.low %v191_v1, %v191_v1 }
  0x11   : > { %795 = vmatpush3.bf16.xpose.msra.mxu0 %v197_v2  ;;  %v190_v4 = vmul.bf16 1052065461, %v189_v3 }
  0x12   : > { %812 = vmatprep.subr.bf16.mxu0 %v919_v0  ;;  %254 = vrot.lane.b32.xlu1 %v986_v10, %s921_s20 }
  0x13   : > { %v763_v11 = vcombine.low %v190_v4, %v190_v4 }
  0x16   : > { %311 = vrot.lane.b32.xlu1 %v986_v10, %s922_s21 }
  0x18   : > { %797 = vmatmul.mubr.msk.bf16.vlgmr.msra.gmra.mxu0 %vm192_vm1, %v190_v4 }
  0x19   : > { %814 = vmatprep.mubr.msk.bf16.mxu0 %vm920_vm0, %v919_v0 }
  0x1a   : > { %430 = vrot.lane.b32.xlu1 %v986_v10, %s923_s22 }
  0x1e   : > { %428 = vrot.lane.b32.xlu1 %v763_v11, %s923_s22 }
  0x22   : > { %549 = vrot.lane.b32.xlu1 %v986_v10, %s924_s23 }
  0x26   : > { %547 = vrot.lane.b32.xlu1 %v763_v11, %s924_s23 }
  0x84   : > { %v255_v17 = vpop.permute.xlu1 %254 }
  0x85   : > { %v261_v18 = vsel %vm259_vm2, %v255_v17, 0 }
  0x86   : > { %801 = vmatpush3.bf16.msra.mxu1 %v261_v18 }
  0x87   : > { %806 = vmatprep.subr.bf16.mxu1 %v919_v0 }
  0x88   : > { %v312_v21 = vpop.permute.xlu1 %311 }
  0x89   : > { %v317_v23 = vsel %vm192_vm1, %v312_v21, 0 }
  0x8c   : > { %v431_v25 = vpop.permute.xlu1 %430 }
  0x8d   : > { %v436_v28 = vsel %vm192_vm1, %v431_v25, 0 }
  0x90   : > { %v429_v27 = vpop.permute.xlu1 %428 }
  0x94   : > { %v550_v29 = vpop.permute.xlu1 %549 }
  0x95   : > { %v555_v30 = vsel %vm192_vm1, %v550_v29, 0 }
  0x98   : > { %v548_v31 = vpop.permute.xlu1 %547 }
  0xd8   : > { %v233_v5 = vpop.f32.mrf.mxu0 }
  0xd9   : > { %v239_v6 = vsel %vm192_vm1, %v233_v5, -inf }
  0xda   : > { %240 = vmax.xlane.f32.xlu0 %v239_v6  ;;  %v798_v7 = vpop.f32.mrf.mxu0 }
  0xdc   : > { %v236_v8 = vpop.f32.mrf.mxu0 }
  0xde   : > { %v799_v9 = vpop.f32.mrf.mxu0 }
 0x163   : > { %v241_v12 = vpop.xlane.xlu0 %240 }
 0x164   : > { %v242_v13 = vsub.f32 %v233_v5, %v241_v12 }
 0x166   : > { %v243_v14 = vmul.f32 1.442695, %v242_v13 }
 0x168   : > { %879 = vpow2.f32 %v243_v14 }
 0x175   : > { %v880_v15 = vpop.eup %879 }
 0x176   : > { %v245_v16 = vsel %vm192_vm1, %v880_v15, 0.0 }
 0x177   : > { %246 = vadd.xlane.f32.xlu0 %v245_v16 }
 0x18d   : > { %309 = vrot.lane.b32.xlu0 %v763_v11, %s922_s21 }
 0x200   : > { %v247_v19 = vpop.xlane.xlu0 %246 }
 0x201   : > { %881 = vrcp.f32 %v247_v19 }
 0x204   : > { %v310_v26 = vpop.permute.xlu0 %309 }
 0x20e   : > { %v882_v20 = vpop.eup %881 }
 0x20f   : > { %v249_v22 = vmul.f32 %v882_v20, %v880_v15 }
 0x211   : > { %v250_v24 = vpack.c.bf16 %v249_v22, %v249_v22 }
 0x213   : > { %803 = vmatmul.mubr.msk.bf16.vlgmr.msra.gmra.mxu1 %vm192_vm1, %v250_v24 }
 0x214   : > { %807 = vmatpush3.bf16.xpose.msra.mxu1 %v317_v23  ;;  %808 = vmatprep.mubr.msk.bf16.mxu1 %vm920_vm0, %v919_v0 }
 0x215   : > { %818 = vmatprep.subr.bf16.mxu1 %v919_v0 }
 0x21b   : > { %809 = vmatmul.mubr.msk.bf16.vlgmr.msra.gmra.mxu1 %vm192_vm1, %v310_v26 }
 0x21c   : > { %819 = vmatpush3.bf16.xpose.msra.mxu1 %v436_v28  ;;  %820 = vmatprep.mubr.msk.bf16.mxu1 %vm920_vm0, %v919_v0 }
 0x21d   : > { %830 = vmatprep.subr.bf16.mxu1 %v919_v0 }
 0x223   : > { %821 = vmatmul.mubr.msk.bf16.vlgmr.msra.gmra.mxu1 %vm192_vm1, %v429_v27 }
 0x224   : > { %831 = vmatpush3.bf16.xpose.msra.mxu1 %v555_v30  ;;  %832 = vmatprep.mubr.msk.bf16.mxu1 %vm920_vm0, %v919_v0 }
 0x22b   : > { %833 = vmatmul.mubr.msk.bf16.vlgmr.msra.gmra.mxu1 %vm192_vm1, %v548_v31 }
 0x2d3   : > { %v297_v32 = vpop.f32.mrf.mxu1 }
 0x2d4   : > { %v303_v33 = vpack.c.bf16 %v297_v32, %v297_v32 }
 0x2d5   : > { %v804_v34 = vpop.f32.mrf.mxu1 }
 0x2d6   : > { %305 = vst.msk [vmem:[%s1014_s26] sm:$0xf] %vm304_vm3, %v303_v33 }
 0x2d7   : > { %v300_v35 = vpop.f32.mrf.mxu1 }
 0x2d9   : > { %v805_v36 = vpop.f32.mrf.mxu1 }
 0x2db   : > { %v353_v37 = vpop.f32.mrf.mxu1 }
 0x2dc   : > { %v359_v38 = vsel %vm192_vm1, %v353_v37, -inf }
 0x2dd   : > { %360 = vmax.xlane.f32.xlu1 %v359_v38  ;;  %v810_v39 = vpop.f32.mrf.mxu1 }
 0x2df   : > { %v356_v40 = vpop.f32.mrf.mxu1 }
 0x2e1   : > { %v811_v41 = vpop.f32.mrf.mxu1 }
 0x2e3   : > { %v472_v42 = vpop.f32.mrf.mxu1 }
 0x2e4   : > { %v478_v43 = vsel %vm192_vm1, %v472_v42, -inf }
 0x2e5   : > { %479 = vmax.xlane.f32.xlu0 %v478_v43  ;;  %v822_v44 = vpop.f32.mrf.mxu1 }
 0x2e7   : > { %v475_v45 = vpop.f32.mrf.mxu1 }
 0x2e9   : > { %v823_v46 = vpop.f32.mrf.mxu1 }
 0x2eb   : > { %v591_v47 = vpop.f32.mrf.mxu1 }
 0x2ec   : > { %v597_v48 = vsel %vm192_vm1, %v591_v47, -inf }
 0x2ed   : > { %598 = vmax.xlane.f32.xlu1 %v597_v48  ;;  %v834_v49 = vpop.f32.mrf.mxu1 }
 0x2ef   : > { %v594_v50 = vpop.f32.mrf.mxu1 }
 0x2f1   : > { %v835_v51 = vpop.f32.mrf.mxu1 }
 0x2fe   : > { %371 = vrot.lane.b32.xlu1 %v986_v10, %s925_s27 }
 0x366   : > { %v361_v52 = vpop.xlane.xlu1 %360 }
 0x367   : > { %v362_v53 = vsub.f32 %v353_v37, %v361_v52 }
 0x369   : > { %v363_v54 = vmul.f32 1.442695, %v362_v53 }
 0x36b   : > { %883 = vpow2.f32 %v363_v54 }
 0x36e   : > { %v480_v55 = vpop.xlane.xlu0 %479 }
 0x36f   : > { %v481_v56 = vsub.f32 %v472_v42, %v480_v55 }
 0x371   : > { %v482_v57 = vmul.f32 1.442695, %v481_v56 }
 0x373   : > { %885 = vpow2.f32 %v482_v57 }
 0x376   : > { %v599_v58 = vpop.xlane.xlu1 %598 }
 0x377   : > { %v600_v59 = vsub.f32 %v591_v47, %v599_v58 }
 0x378   : > { %v884_v60 = vpop.eup %883 }
 0x379   : > { %v601_v61 = vmul.f32 1.442695, %v600_v59  ;;  %v365_v62 = vsel %vm192_vm1, %v884_v60, 0.0 }
 0x37a   : > { %366 = vadd.xlane.f32.xlu0 %v365_v62  ;;  %v372_v63 = vpop.permute.xlu1 %371 }
 0x37b   : > { %887 = vpow2.f32 %v601_v61  ;;  %v377_v1 = vsel %vm259_vm2, %v372_v63, 0 }
 0x37c   : > { %813 = vmatpush3.bf16.msra.mxu0 %v377_v1 }
 0x37d   : > { %824 = vmatprep.subr.bf16.mxu0 %v919_v0 }
 0x380   : > { %v886_v2 = vpop.eup %885 }
 0x381   : > { %v484_v3 = vsel %vm192_vm1, %v886_v2, 0.0 }
 0x382   : > { %485 = vadd.xlane.f32.xlu1 %v484_v3 }
 0x388   : > { %v888_v4 = vpop.eup %887 }
 0x389   : > { %v603_v5 = vsel %vm192_vm1, %v888_v4, 0.0 }
 0x38a   : > { %604 = vadd.xlane.f32.xlu0 %v603_v5 }
 0x393   : > { %609 = vrot.lane.b32.xlu1 %v986_v10, %s926_s28 }
 0x3a0   : > { %490 = vrot.lane.b32.xlu0 %v986_v10, %s927_s29 }
 0x403   : > { %v367_v6 = vpop.xlane.xlu0 %366 }
 0x404   : > { %889 = vrcp.f32 %v367_v6 }
 0x40b   : > { %v486_v7 = vpop.xlane.xlu1 %485 }
 0x40c   : > { %891 = vrcp.f32 %v486_v7 }
 0x40f   : > { %v610_v10 = vpop.permute.xlu1 %609 }
 0x410   : > { %v615_v18 = vsel %vm259_vm2, %v610_v10, 0 }
 0x411   : > { %v890_v8 = vpop.eup %889 }
 0x412   : > { %v369_v9 = vmul.f32 %v890_v8, %v884_v60 }
 0x413   : > { %v605_v11 = vpop.xlane.xlu0 %604 }
 0x414   : > { %893 = vrcp.f32 %v605_v11  ;;  %v370_v12 = vpack.c.bf16 %v369_v9, %v369_v9 }
 0x416   : > { %815 = vmatmul.mubr.msk.bf16.vlgmr.msra.gmra.mxu0 %vm192_vm1, %v370_v12 }
 0x417   : > { %v491_v13 = vpop.permute.xlu0 %490  ;;  %826 = vmatprep.mubr.msk.bf16.mxu0 %vm920_vm0, %v919_v0 }
 0x418   : > { %v496_v14 = vsel %vm259_vm2, %v491_v13, 0 }
 0x419   : > { %v892_v15 = vpop.eup %891  ;;  %825 = vmatpush3.bf16.msra.mxu0 %v496_v14 }
 0x41a   : > { %v488_v16 = vmul.f32 %v892_v15, %v886_v2  ;;  %836 = vmatprep.subr.bf16.mxu0 %v919_v0 }
 0x41c   : > { %v489_v17 = vpack.c.bf16 %v488_v16, %v488_v16 }
 0x41e   : > { %827 = vmatmul.mubr.msk.bf16.vlgmr.msra.gmra.mxu0 %vm192_vm1, %v489_v17 }
 0x41f   : > { %837 = vmatpush3.bf16.msra.mxu0 %v615_v18  ;;  %838 = vmatprep.mubr.msk.bf16.mxu0 %vm920_vm0, %v919_v0 }
 0x421   : > { %v894_v19 = vpop.eup %893 }
 0x422   : > { %v607_v20 = vmul.f32 %v894_v19, %v888_v4 }
 0x424   : > { %v608_v21 = vpack.c.bf16 %v607_v20, %v607_v20 }
 0x426   : > { %839 = vmatmul.mubr.msk.bf16.vlgmr.msra.gmra.mxu0 %vm192_vm1, %v608_v21 }
 0x4d6   : > { %v413_v22 = vpop.f32.mrf.mxu0 }
 0x4d7   : > { %v775_v23 = vpack.c.bf16 %v413_v22, %v413_v22 }
 0x4d8   : > { %v816_v24 = vpop.f32.mrf.mxu0 }
 0x4d9   : > { %423 = vrot.lane.b32.xlu1 %v775_v23, %s928_s30 }
 0x4da   : > { %v416_v25 = vpop.f32.mrf.mxu0 }
 0x4dc   : > { %v817_v26 = vpop.f32.mrf.mxu0 }
 0x4de   : > { %v532_v27 = vpop.f32.mrf.mxu0 }
 0x4df   : > { %v776_v28 = vpack.c.bf16 %v532_v27, %v532_v27 }
 0x4e0   : > { %v828_v29 = vpop.f32.mrf.mxu0 }
 0x4e1   : > { %542 = vrot.lane.b32.xlu0 %v776_v28, %s929_s3 }
 0x4e2   : > { %v535_v0 = vpop.f32.mrf.mxu0 }
 0x4e4   : > { %v829_v30 = vpop.f32.mrf.mxu0 }
 0x4e6   : > { %v651_v31 = vpop.f32.mrf.mxu0 }
 0x4e7   : > { %v777_v32 = vpack.c.bf16 %v651_v31, %v651_v31 }
 0x4e8   : > { %v840_v33 = vpop.f32.mrf.mxu0 }
 0x4e9   : > { %661 = vrot.lane.b32.xlu1 %v777_v32, %s930_s4 }
 0x4ea   : > { %v654_v34 = vpop.f32.mrf.mxu0 }
 0x4ec   : > { %v841_v35 = vpop.f32.mrf.mxu0 }
 0x54b   : > { %v424_v36 = vpop.permute.xlu1 %423 }
 0x54c   : > { %427 = vst.msk [vmem:[%s1014_s26] sm:$0xf] %vm426_vm4, %v424_v36 }
 0x553   : > { %v543_v37 = vpop.permute.xlu0 %542 }
 0x554   : > { %546 = vst.msk [vmem:[%s1014_s26] sm:$0xf] %vm545_vm5, %v543_v37 }
 0x55b   : > { %v662_v38 = vpop.permute.xlu1 %661 }
 0x55c   : > { %665 = vst.msk [vmem:[%s1014_s26] sm:$0xf] %vm664_vm6, %v662_v38 }
 0x55d PF: > { %s12_s11 = sadd.s32 1, %s917_s11   ;;  %s1053_s9 = smov %s913_s10 }
 0x55e   : > { %p9_p5 = scmp.ge.s32.totalorder %s12_s11, 4   ;;  %s1054_s10 = smov %s1056_s12 }
 0x560   :  { %11 = sbr.rel (!%p9_p5) target bundleno = 2 (0x2), region = 61 }

// kernel: bert_encoder.26
= control target key start
LH: loop header
LB: loop body
LE: loop exit
PB: predicated region body
PF: predicated region fallthrough
CT: control target
= control target key end

     0   :  { %vm34_vm0 = vcmask 261120   ;;  %v352_v0 = vmov 0.0   ;;  %vm353_vm1 = vmmov 0   ;;  %vm157_vm2 = vcmask 523264   ;;  %s450_s1 = inlined_call_operand.vmem [shape: bf16[32,64], index: 1, kind: input, shape index: {}]   ;;  %s451_s0 = inlined_call_operand.vmem [shape: bf16[16,32], index: 0, kind: input, shape index: {}, may-alias: {0,5}]   ;;  %s452_s3 = inlined_call_operand.vmem [shape: bf16[64,32], index: 3, kind: input, shape index: {}]   ;;  %s453_s2 = inlined_call_operand.vmem [shape: f32[1,64], index: 2, kind: input, shape index: {}]   ;;  %s454_s5 = inlined_call_operand.vmem [shape: bf16[16,32], index: 5, kind: input, shape index: {}, may-alias: {0,5}]   ;;  %s455_s4 = inlined_call_operand.vmem [shape: f32[1,32], index: 4, kind: input, shape index: {}]   ;;  %s456_s6 = inlined_call_operand.vmem [shape: f32[1,32], index: 6, kind: input, shape index: {}]   ;;  %s457_s7 = inlined_call_operand.vmem [shape: f32[1,32], index: 7, kind: input, shape index: {}]   ;;  %s458_s8 = inlined_call_operand.vmem [shape: bf16[16,32], index: 8, kind: output, shape index: {}]  }
   0x1   :  { %315 = vmatprep.subr.bf16.mxu0 %v352_v0  ;;  %v337_v1 = vld [vmem:[%s450_s1 + $0x8] sm:$0xff]   ;;  %319 = vmatprep.mubr.msk.bf16.mxu0 %vm353_vm1, %v352_v0  ;;  %35 = vst.msk [vmem:[#allocation2] sm:$0xff] %vm34_vm0, %v352_v0  ;;  %36 = vst.msk [vmem:[#allocation2 + $0x8] sm:$0xff] %vm34_vm0, %v352_v0  ;;  %v338_v2 = vld [vmem:[%s450_s1] sm:$0xff]   ;;  %vm279_vm3 = vcmask 257024  }
   0x2   :  { %323 = vmatprep.subr.bf16.mxu1 %v352_v0  ;;  %331 = vmatprep.mubr.msk.bf16.mxu1 %vm353_vm1, %v352_v0  ;;  %v339_v3 = vld [vmem:[%s451_s0] sm:$0xff]   ;;  %v340_v4 = vld [vmem:[%s452_s3 + $0x18] sm:$0xff]   ;;  %v341_v5 = vld [vmem:[%s452_s3 + $0x10] sm:$0xff]  }
   0x3   :  { %316 = vmatpush3.bf16.msra.mxu0 %v337_v1  ;;  %324 = vmatpush3.bf16.msra.mxu1 %v340_v4  ;;  %v342_v6 = vld [vmem:[%s452_s3 + $0x8] sm:$0xff]   ;;  %v343_v7 = vld [vmem:[%s452_s3] sm:$0xff]  }
   0x4   :  { %317 = vmatprep.subr.bf16.mxu0 %v352_v0  ;;  %325 = vmatprep.subr.bf16.mxu1 %v352_v0  ;;  %v286_v8 = vld [vmem:[%s453_s2] ss:$0 sm:$0xff] }
   0x5   :  { %v304_v34 = vld [vmem:[%s454_s5] sm:$0xff]  }
   0x6   :  { %v296_v35 = vld [vmem:[%s455_s4] ss:$0 sm:$0xff]  ;;  %v305_v36 = vunpack.c.l.bf16 %v304_v34  ;;  %v306_v40 = vunpack.c.h.bf16 %v304_v34 }
   0x7   :  { %318 = vmatpush3.bf16.msra.mxu0 %v338_v2  ;;  %326 = vmatpush3.bf16.msra.mxu1 %v341_v5  ;;  %v297_v63 = vld [vmem:[%s456_s6] ss:$0 sm:$0xff] }
   0x8   :  { %327 = vmatprep.subr.bf16.mxu1 %v352_v0  ;;  %v122_v26 = vld [vmem:[#allocation2] sm:$0xff]  ;;  %v123_v30 = vld [vmem:[#allocation2 + $0x8] sm:$0xff] }
   0x9   :  { %v298_v1 = vld [vmem:[%s457_s7] ss:$0 sm:$0xff] }
   0xa   :  { %320 = vmatmul.mubr.msk.bf16.vlgmr.msra.gmra.mxu0 %vm34_vm0, %v339_v3 }
   0xb   :  { %328 = vmatpush3.bf16.msra.mxu1 %v342_v6 }
   0xc   :  { %329 = vmatprep.subr.bf16.mxu1 %v352_v0 }
   0xf   :  { %330 = vmatpush3.bf16.msra.mxu1 %v343_v7 }
  0xca   :  { %v105_v9 = vpop.f32.mrf.mxu0 }
  0xcb   :  { %v106_v10 = vadd.f32 %v286_v8, %v105_v9 }
  0xcc   :  { %v321_v11 = vpop.f32.mrf.mxu0 }
  0xcd   :  { %v114_v12 = vmul.f32 0.70710677, %v106_v10  ;;  %v112_v20 = vmul.f32 0.5, %v106_v10 }
  0xce   :  { %v108_v13 = vpop.f32.mrf.mxu0 }
  0xcf   :  { %344 = verf.f32 %v114_v12  ;;  %v109_v14 = vadd.f32 %v286_v8, %v108_v13 }
  0xd0   :  { %v322_v15 = vpop.f32.mrf.mxu0 }
  0xd1   :  { %v115_v16 = vmul.f32 0.70710677, %v109_v14  ;;  %v113_v21 = vmul.f32 0.5, %v109_v14 }
  0xd3   :  { %346 = verf.f32 %v115_v16 }
  0xdc   :  { %v345_v17 = vpop.eup %344 }
  0xdd   :  { %v118_v18 = vadd.f32 1.0, %v345_v17 }
  0xdf   :  { %v120_v23 = vmul.f32 %v118_v18, %v112_v20 }
  0xe0   :  { %v347_v19 = vpop.eup %346 }
  0xe1   :  { %v119_v22 = vadd.f32 1.0, %v347_v19 }
  0xe3   :  { %v121_v24 = vmul.f32 %v119_v22, %v113_v21 }
  0xe5   :  { %v124_v25 = vpack.c.bf16 %v121_v24, %v120_v23 }
  0xe7   :  { %332 = vmatmul.mubr.msk.bf16.vlgmr.msra.gmra.mxu1 %vm157_vm2, %v124_v25 }
 0x1a7   :  { %v195_v27 = vpop.f32.mrf.mxu1 }
 0x1a8   :  { %v202_v28 = vadd.f32 %v195_v27, %v122_v26 }
 0x1a9   :  { %v333_v29 = vpop.f32.mrf.mxu1 }
 0x1aa   :  { %204 = vst.msk [vmem:[#allocation2] sm:$0xff] %vm34_vm0, %v202_v28 }
 0x1ab   :  { %v198_v31 = vpop.f32.mrf.mxu1 }
 0x1ac   :  { %v203_v32 = vadd.f32 %v198_v31, %v123_v30 }
 0x1ad   :  { %v334_v33 = vpop.f32.mrf.mxu1 }
 0x1ae   :  { %205 = vst.msk [vmem:[#allocation2 + $0x8] sm:$0xff] %vm34_vm0, %v203_v32 }
 0x1b1   :  { %v209_v37 = vld [vmem:[#allocation2] sm:$0xff] }
 0x1b2   :  { %v218_v38 = vadd.f32 %v296_v35, %v209_v37 }
 0x1b4   :  { %v224_v39 = vadd.f32 %v305_v36, %v218_v38 }
 0x1b5   :  { %v210_v41 = vld [vmem:[#allocation2 + $0x8] sm:$0xff] }
 0x1b6   :  { %v226_v42 = vsel %vm34_vm0, %v224_v39, 0.0  ;;  %v219_v43 = vadd.f32 %v296_v35, %v210_v41 }
 0x1b7   :  { %227 = vadd.xlane.f32.xlu0 %v226_v42 }
 0x1b8   :  { %v225_v44 = vadd.f32 %v306_v40, %v219_v43 }
 0x1ba   :  { %v229_v45 = vsel %vm34_vm0, %v225_v44, 0.0 }
 0x1bb   :  { %230 = vadd.xlane.f32.xlu0 %v229_v45 }
 0x240   :  { %v228_v46 = vpop.xlane.xlu0 %227 }
 0x241   :  { %v233_v47 = vmul.f32 0.03125, %v228_v46 }
 0x243   :  { %v235_v48 = vsub.f32 %v224_v39, %v233_v47 }
 0x244   :  { %v231_v49 = vpop.xlane.xlu0 %230 }
 0x245   :  { %v234_v50 = vmul.f32 0.03125, %v231_v49  ;;  %v237_v51 = vmul.f32 %v235_v48, %v235_v48 }
 0x247   :  { %v236_v52 = vsub.f32 %v225_v44, %v234_v50  ;;  %v239_v53 = vsel %vm34_vm0, %v237_v51, 0.0 }
 0x248   :  { %240 = vadd.xlane.f32.xlu1 %v239_v53 }
 0x249   :  { %v238_v54 = vmul.f32 %v236_v52, %v236_v52 }
 0x24b   :  { %v242_v55 = vsel %vm34_vm0, %v238_v54, 0.0 }
 0x24c   :  { %243 = vadd.xlane.f32.xlu1 %v242_v55 }
 0x2d1   :  { %v241_v56 = vpop.xlane.xlu1 %240 }
 0x2d2   :  { %v245_v57 = vmul.f32 0.03125, %v241_v56 }
 0x2d4   :  { %v247_v58 = vadd.f32 1e-12, %v245_v57 }
 0x2d5   :  { %v244_v59 = vpop.xlane.xlu1 %243 }
 0x2d6   :  { %348 = vrsqrt.f32 %v247_v58  ;;  %v246_v60 = vmul.f32 0.03125, %v244_v59 }
 0x2d8   :  { %v248_v61 = vadd.f32 1e-12, %v246_v60 }
 0x2da   :  { %350 = vrsqrt.f32 %v248_v61 }
 0x2e3   :  { %v349_v62 = vpop.eup %348 }
 0x2e4   :  { %v251_v0 = vmul.f32 %v349_v62, %v235_v48 }
 0x2e6   :  { %v260_v2 = vmul.f32 %v297_v63, %v251_v0 }
 0x2e7   :  { %v351_v3 = vpop.eup %350 }
 0x2e8   :  { %v269_v4 = vadd.f32 %v298_v1, %v260_v2  ;;  %v252_v5 = vmul.f32 %v351_v3, %v236_v52 }
 0x2ea   :  { %v301_v6 = vpack.c.bf16 %v269_v4, %v269_v4  ;;  %v261_v7 = vmul.f32 %v297_v63, %v252_v5 }
 0x2ec   :  { %280 = vst.msk [vmem:[%s458_s8] sm:$0xf] %vm279_vm3, %v301_v6  ;;  %v270_v8 = vadd.f32 %v298_v1, %v261_v7 }
 0x2ee   :  { %v302_v9 = vpack.c.bf16 %v270_v8, %v270_v8 }
 0x2f0   :  { %281 = vst.msk [vmem:[%s458_s8 + $0x4] sm:$0xf] %vm279_vm3, %v302_v9 }

// kernel: bert_encoder.35
= control target key start
LH: loop header
LB: loop body
LE: loop exit
PB: predicated region body
PF: predicated region fallthrough
CT: control target
= control target key end

     0   :  { %v390_v1 = vmov 0.0   ;;  %vm391_vm0 = vmmov 0   ;;  %vm35_vm1 = vcmask 261120   ;;  %s488_s0 = inlined_call_operand.vmem [shape: bf16[16,32], index: 0, kind: input, shape index: {}, may-alias: {0,5}]   ;;  %s489_s1 = inlined_call_operand.vmem [shape: bf16[32,64], index: 1, kind: input, shape index: {}]   ;;  %s490_s2 = inlined_call_operand.vmem [shape: f32[1,64], index: 2, kind: input, shape index: {}]   ;;  %s491_s3 = inlined_call_operand.vmem [shape: bf16[64,32], index: 3, kind: input, shape index: {}]   ;;  %s492_s4 = inlined_call_operand.vmem [shape: f32[1,32], index: 4, kind: input, shape index: {}]   ;;  %s493_s5 = inlined_call_operand.vmem [shape: bf16[16,32], index: 5, kind: input, shape index: {}, may-alias: {0,5}]   ;;  %s494_s6 = inlined_call_operand.vmem [shape: f32[1,32], index: 6, kind: input, shape index: {}]   ;;  %s495_s7 = inlined_call_operand.vmem [shape: f32[1,32], index: 7, kind: input, shape index: {}]   ;;  %s496_s8 = inlined_call_operand.hbm [shape: bf16[16,32], index: 8, kind: output, shape index: {}]  }
   0x1   :  { %v353_v0 = vld [vmem:[%s489_s1 + $0x8] sm:$0xff]   ;;  %328 = vmatprep.subr.bf16.mxu0 %v390_v1  ;;  %336 = vmatprep.subr.bf16.mxu1 %v390_v1  ;;  %v354_v2 = vld [vmem:[%s489_s1] sm:$0xff]   ;;  %36 = vst.msk [vmem:[#allocation2] sm:$0xff] %vm35_vm1, %v390_v1  ;;  %37 = vst.msk [vmem:[#allocation2 + $0x8] sm:$0xff] %vm35_vm1, %v390_v1 }
   0x2   :  { %329 = vmatpush3.bf16.msra.mxu0 %v353_v0  ;;  %332 = vmatprep.mubr.msk.bf16.mxu0 %vm391_vm0, %v390_v1  ;;  %v355_v3 = vld [vmem:[%s488_s0] sm:$0xff]  }
   0x3   :  { %330 = vmatprep.subr.bf16.mxu0 %v390_v1  ;;  %344 = vmatprep.mubr.msk.bf16.mxu1 %vm391_vm0, %v390_v1 }
   0x6   :  { %331 = vmatpush3.bf16.msra.mxu0 %v354_v2 }
   0x7   :  { %13 = vsyncpa [#allocation4], 0  ;;  %v356_v4 = vld [vmem:[%s491_s3 + $0x18] sm:$0xff]   ;;  %v357_v5 = vld [vmem:[%s491_s3 + $0x10] sm:$0xff]   ;;  %vm158_vm2 = vcmask 523264   ;;  %vm280_vm3 = vcmask 257024  }
   0x8   :  { %337 = vmatpush3.bf16.msra.mxu1 %v356_v4  ;;  %v358_v6 = vld [vmem:[%s491_s3 + $0x8] sm:$0xff]   ;;  %v359_v7 = vld [vmem:[%s491_s3] sm:$0xff]   ;;  %s392_s23 = smov [#allocation3]  }
   0x9   :  { %333 = vmatmul.mubr.msk.bf16.vlgmr.msra.gmra.mxu0 %vm35_vm1, %v355_v3  ;;  %338 = vmatprep.subr.bf16.mxu1 %v390_v1  ;;  %v299_v8 = vld [vmem:[%s490_s2] ss:$0 sm:$0xff]  ;;  %v124_v30 = vld [vmem:[#allocation2 + $0x8] sm:$0xff]  ;;  %s288_s24 = sshll.u32 %s392_s23, 4  ;;  %s289_s24 = int_to_ptr.vmem [resolvable:$true] %s288_s24 }
   0xa   :  { %v123_v26 = vld [vmem:[#allocation2] sm:$0xff]  ;;  %p373_p1 = scmp.lt.s32.totalorder %s289_s24, %s289_s24 }
   0xb   :  { %v317_v34 = vld [vmem:[%s493_s5] sm:$0xff]  }
   0xc   :  { %339 = vmatpush3.bf16.msra.mxu1 %v357_v5  ;;  %v309_v35 = vld [vmem:[%s492_s4] ss:$0 sm:$0xff]  ;;  %v318_v36 = vunpack.c.l.bf16 %v317_v34  ;;  %v319_v40 = vunpack.c.h.bf16 %v317_v34 }
   0xd   :  { %340 = vmatprep.subr.bf16.mxu1 %v390_v1  ;;  %v310_v63 = vld [vmem:[%s494_s6] ss:$0 sm:$0xff]  ;;  %s368_s6 = scalar_lea.vmem %s289_s24, 128 }
   0xe   :  { %p369_p0 = scmp.ne.s32.totalorder %s289_s24, %s368_s6  ;;  %p374_p2 = scmp.lt.s32.totalorder %s368_s6, %s368_s6 }
  0x10   :  { %341 = vmatpush3.bf16.msra.mxu1 %v358_v6  ;;  %p375_p3 = por %p374_p2, %p373_p1 }
  0x11   :  { %342 = vmatprep.subr.bf16.mxu1 %v390_v1  ;;  %v311_v1 = vld [vmem:[%s495_s7] ss:$0 sm:$0xff] }
  0x12   :  { %p376_p4 = pnand %p375_p3, %p369_p0 }
  0x14   :  { %343 = vmatpush3.bf16.msra.mxu1 %v359_v7 }
  0xc9   :  { %v106_v9 = vpop.f32.mrf.mxu0 }
  0xca   :  { %v107_v10 = vadd.f32 %v299_v8, %v106_v9 }
  0xcb   :  { %v334_v11 = vpop.f32.mrf.mxu0 }
  0xcc   :  { %v115_v12 = vmul.f32 0.70710677, %v107_v10  ;;  %v113_v20 = vmul.f32 0.5, %v107_v10 }
  0xcd   :  { %v109_v13 = vpop.f32.mrf.mxu0 }
  0xce   :  { %360 = verf.f32 %v115_v12  ;;  %v110_v14 = vadd.f32 %v299_v8, %v109_v13 }
  0xcf   :  { %v335_v15 = vpop.f32.mrf.mxu0 }
  0xd0   :  { %v116_v16 = vmul.f32 0.70710677, %v110_v14  ;;  %v114_v21 = vmul.f32 0.5, %v110_v14 }
  0xd2   :  { %362 = verf.f32 %v116_v16 }
  0xdb   :  { %v361_v17 = vpop.eup %360 }
  0xdc   :  { %v119_v18 = vadd.f32 1.0, %v361_v17 }
  0xde   :  { %v121_v23 = vmul.f32 %v119_v18, %v113_v20 }
  0xdf   :  { %v363_v19 = vpop.eup %362 }
  0xe0   :  { %v120_v22 = vadd.f32 1.0, %v363_v19 }
  0xe2   :  { %v122_v24 = vmul.f32 %v120_v22, %v114_v21 }
  0xe4   :  { %v125_v25 = vpack.c.bf16 %v122_v24, %v121_v23 }
  0xe6   :  { %345 = vmatmul.mubr.msk.bf16.vlgmr.msra.gmra.mxu1 %vm158_vm2, %v125_v25 }
 0x1a6   :  { %v196_v27 = vpop.f32.mrf.mxu1 }
 0x1a7   :  { %v203_v28 = vadd.f32 %v196_v27, %v123_v26 }
 0x1a8   :  { %v346_v29 = vpop.f32.mrf.mxu1 }
 0x1a9   :  { %205 = vst.msk [vmem:[#allocation2] sm:$0xff] %vm35_vm1, %v203_v28 }
 0x1aa   :  { %v199_v31 = vpop.f32.mrf.mxu1 }
 0x1ab   :  { %v204_v32 = vadd.f32 %v199_v31, %v124_v30 }
 0x1ac   :  { %v347_v33 = vpop.f32.mrf.mxu1 }
 0x1ad   :  { %206 = vst.msk [vmem:[#allocation2 + $0x8] sm:$0xff] %vm35_vm1, %v204_v32 }
 0x1b0   :  { %v210_v37 = vld [vmem:[#allocation2] sm:$0xff] }
 0x1b1   :  { %v219_v38 = vadd.f32 %v309_v35, %v210_v37 }
 0x1b3   :  { %v225_v39 = vadd.f32 %v318_v36, %v219_v38 }
 0x1b4   :  { %v211_v41 = vld [vmem:[#allocation2 + $0x8] sm:$0xff] }
 0x1b5   :  { %v227_v42 = vsel %vm35_vm1, %v225_v39, 0.0  ;;  %v220_v43 = vadd.f32 %v309_v35, %v211_v41 }
 0x1b6   :  { %228 = vadd.xlane.f32.xlu0 %v227_v42 }
 0x1b7   :  { %v226_v44 = vadd.f32 %v319_v40, %v220_v43 }
 0x1b9   :  { %v230_v45 = vsel %vm35_vm1, %v226_v44, 0.0 }
 0x1ba   :  { %231 = vadd.xlane.f32.xlu0 %v230_v45 }
 0x23f   :  { %v229_v46 = vpop.xlane.xlu0 %228 }
 0x240   :  { %v234_v47 = vmul.f32 0.03125, %v229_v46 }
 0x242   :  { %v236_v48 = vsub.f32 %v225_v39, %v234_v47 }
 0x243   :  { %v232_v49 = vpop.xlane.xlu0 %231 }
 0x244   :  { %v235_v50 = vmul.f32 0.03125, %v232_v49  ;;  %v238_v51 = vmul.f32 %v236_v48, %v236_v48 }
 0x246   :  { %v237_v52 = vsub.f32 %v226_v44, %v235_v50  ;;  %v240_v53 = vsel %vm35_vm1, %v238_v51, 0.0 }
 0x247   :  { %241 = vadd.xlane.f32.xlu1 %v240_v53 }
 0x248   :  { %v239_v54 = vmul.f32 %v237_v52, %v237_v52 }
 0x24a   :  { %v243_v55 = vsel %vm35_vm1, %v239_v54, 0.0 }
 0x24b   :  { %244 = vadd.xlane.f32.xlu1 %v243_v55 }
 0x2d0   :  { %v242_v56 = vpop.xlane.xlu1 %241 }
 0x2d1   :  { %v246_v57 = vmul.f32 0.03125, %v242_v56 }
 0x2d3   :  { %v248_v58 = vadd.f32 1e-12, %v246_v57 }
 0x2d4   :  { %v245_v59 = vpop.xlane.xlu1 %244 }
 0x2d5   :  { %364 = vrsqrt.f32 %v248_v58  ;;  %v247_v60 = vmul.f32 0.03125, %v245_v59 }
 0x2d7   :  { %v249_v61 = vadd.f32 1e-12, %v247_v60 }
 0x2d9   :  { %366 = vrsqrt.f32 %v249_v61 }
 0x2e2   :  { %v365_v62 = vpop.eup %364 }
 0x2e3   :  { %v252_v0 = vmul.f32 %v365_v62, %v236_v48 }
 0x2e5   :  { %v261_v2 = vmul.f32 %v310_v63, %v252_v0 }
 0x2e6   :  { %v367_v3 = vpop.eup %366 }
 0x2e7   :  { %v253_v4 = vmul.f32 %v367_v3, %v237_v52  ;;  %v270_v5 = vadd.f32 %v311_v1, %v261_v2 }
 0x2e9   :  { %v262_v6 = vmul.f32 %v310_v63, %v253_v4  ;;  %v314_v7 = vpack.c.bf16 %v270_v5, %v270_v5 }
 0x2eb   :  { %v271_v8 = vadd.f32 %v311_v1, %v262_v6  ;;  %281 = vst.msk [vmem:[#allocation3] sm:$0xf] %vm280_vm3, %v314_v7 }
 0x2ed   :  { %v315_v9 = vpack.c.bf16 %v271_v8, %v271_v8 }
 0x2ef   :  { %282 = vst.msk [vmem:[#allocation3 + $0x4] sm:$0xf] %vm280_vm3, %v315_v9 }
 0x2f0   :  { %379 = shalt.err (!%p376_p4)
}
 0x2f1   :  { %s393_s7 = smov 64   ;;  %s394_s25 = smov 4  }
 0x2f2   :  { %294 = dma.vmem_to_hbm [thread:$0]  %s289_s24, 128, %s496_s8, [#allocation4], %s393_s7, %s393_s7, %s394_s25  }
 0x2f3   :  { %388 = dma.done.wait [#allocation4], 128  }
 0x2f4   :  { %389 = vsyncadd [#allocation4], 4294967168 }
 0x2f5   :  { %298 = vsyncpa [#allocation4], 1 }

</bundles_post_ra>
